<compile_context>
chip_gen: v6e
topology: v6e:2x2x1
jax: 0.10.0
libtpu: 0.0.40
codegen_flags: <defaults>
</compile_context>

<pallas_src>
import random

import jax
import jax.numpy as jnp
import numpy as np
from jax.experimental import pallas as pl
from jax.experimental.pallas import tpu as pltpu

X_DIM = 150
H_DIM = 150
H2_DIM = 50
H3_DIM = 25
N_CLS = 2
CURRENT_SHIFT = 3

MAX_PHASE1 = 30                    # `while i < 30`
MAX_PHASE2 = 10                    # `for j in range(min(10, x - i))`
MAX_T = MAX_PHASE1 + MAX_PHASE2    # 40 (multiple of 8 -> clean sublane tiling)


def _pad128(n):
    return ((n + 127) // 128) * 128


X_PAD = _pad128(X_DIM)    # 256
H_PAD = _pad128(H_DIM)    # 256
G_PAD = 4 * H_PAD         # 1024: gates stacked (i|f|g|o), each block lane-aligned
S1_PAD = _pad128(H2_DIM)  # 128
S2_PAD = _pad128(H3_DIM)  # 128
S3_PAD = _pad128(N_CLS)   # 128


# ----------------------------------------------------------------------------
# Fused kernel: whole recurrence in one pallas_call
# ----------------------------------------------------------------------------
def fused_sequence_kernel(
        x_ref, rand_ref,                       # SMEM: cursor x, pre-sampled uniforms
        xs_ref,                                # VMEM (MAX_T, X_PAD) gathered inputs
        wih_ref, whh_ref, bg_ref,              # stacked LSTM weights (padded)
        w1h_ref, w1x_ref, b1_ref,              # stopsign fc1 split into h / x parts
        w2_ref, b2_ref, w3_ref, b3_ref,
        out_ref, outh_ref, stats_ref,          # outputs
        xproj_ref, h_scr, c_scr, flag_scr, istop_scr):   # scratch
    # ---- hoisted input projection: all timesteps in one M=MAX_T matmul -------
    xproj_ref[...] = (
        jnp.dot(xs_ref[...], wih_ref[...], preferred_element_type=jnp.float32)
        + bg_ref[...])

    h_scr[...] = jnp.zeros((1, H_PAD), jnp.float32)
    c_scr[...] = jnp.zeros((1, H_PAD), jnp.float32)
    istop_scr[0] = jnp.int32(-1)

    x_cursor = x_ref[0]
    cls_lane = jax.lax.broadcasted_iota(jnp.int32, (1, S3_PAD), 1)
    cls_mask = cls_lane < N_CLS     # only the first 2 lanes are real classes
    cls0_mask = cls_lane == 0

    def step(t, carry):
        i_stop = istop_scr[0]
        in_phase1 = i_stop < 0
        n_phase2 = jnp.maximum(
            jnp.int32(0),
            jnp.minimum(jnp.int32(MAX_PHASE2), x_cursor - i_stop))
        active = jnp.where(in_phase1, t < MAX_PHASE1, t < i_stop + n_phase2)

        h = h_scr[...]
        c = c_scr[...]

        # ---- LSTM cell: one wide stacked-gate matmul on the recurrent path ---
        gates = (xproj_ref[pl.ds(t, 1), :]
                 + jnp.dot(h, whh_ref[...], preferred_element_type=jnp.float32))
        i_g = jax.nn.sigmoid(gates[:, 0 * H_PAD:1 * H_PAD])
        f_g = jax.nn.sigmoid(gates[:, 1 * H_PAD:2 * H_PAD])
        g_g = jnp.tanh(gates[:, 2 * H_PAD:3 * H_PAD])
        o_g = jax.nn.sigmoid(gates[:, 3 * H_PAD:4 * H_PAD])
        c_new = f_g * c + i_g * g_g
        h_new = o_g * jnp.tanh(c_new)

        # ---- fused stopsign MLP: relu(fc1) -> relu(fc2) -> softmax(relu(fc3))
        x_row = xs_ref[pl.ds(t, 1), :]
        h1 = jnp.maximum(
            jnp.dot(h_new, w1h_ref[...], preferred_element_type=jnp.float32)
            + jnp.dot(x_row, w1x_ref[...], preferred_element_type=jnp.float32)
            + b1_ref[...], 0.0)
        h2 = jnp.maximum(
            jnp.dot(h1, w2_ref[...], preferred_element_type=jnp.float32)
            + b2_ref[...], 0.0)
        h3 = jnp.maximum(
            jnp.dot(h2, w3_ref[...], preferred_element_type=jnp.float32)
            + b3_ref[...], 0.0)
        m = jnp.max(jnp.where(cls_mask, h3, -jnp.inf), axis=-1, keepdims=True)
        e = jnp.where(cls_mask, jnp.exp(h3 - m), 0.0)
        e0 = jnp.sum(jnp.where(cls0_mask, e, 0.0), axis=-1, keepdims=True)
        esum = jnp.sum(e, axis=-1, keepdims=True)
        # stop rule:  rand > p_stop = e0/esum   <=>   rand * esum > e0
        rand_t = rand_ref[t]
        flag_scr[...] = (rand_t * esum > e0).astype(jnp.int32)
        stopped = flag_scr[0, 0] > 0

        # ---- state / output updates ------------------------------------------
        h_scr[...] = jnp.where(active, h_new, h)
        c_scr[...] = jnp.where(active, c_new, c)
        out_ref[pl.ds(t, 1), :] = jnp.where(
            active, h_new, jnp.zeros((1, H_PAD), jnp.float32))

        ph1_step = jnp.logical_and(in_phase1, active)
        stopped_now = jnp.logical_and(ph1_step, stopped)
        ended = jnp.logical_and(ph1_step, t == MAX_PHASE1 - 1)
        istop_scr[0] = jnp.where(
            stopped_now, t + 1,
            jnp.where(ended, jnp.int32(MAX_PHASE1), i_stop))
        return carry

    jax.lax.fori_loop(0, MAX_T, step, 0)

    i_stop = istop_scr[0]
    n_phase2 = jnp.maximum(
        jnp.int32(0), jnp.minimum(jnp.int32(MAX_PHASE2), x_cursor - i_stop))
    outh_ref[...] = out_ref[pl.ds(i_stop - 1, 1), :]   # last phase-1 hidden state
    stats_ref[0] = i_stop                              # phase-1 iterations (`i`)
    stats_ref[1] = i_stop + n_phase2                   # total valid output rows
    stats_ref[2] = i_stop + 9                          # the module's `i + 9`
    stats_ref[3] = jnp.int32(MAX_T)


def _vmem():
    return pl.BlockSpec(memory_space=pltpu.MemorySpace.VMEM)


def _smem():
    return pl.BlockSpec(memory_space=pltpu.MemorySpace.SMEM)


def gather_inputs(x_cursor, inputx):
    """Rows the recurrence can touch, in walk order: index x-1-t (wraps like
    Python negative indexing, matching the PyTorch behaviour)."""
    seq_len = inputx.shape[1]
    t_idx = (x_cursor - 1 - jnp.arange(MAX_T, dtype=jnp.int32)) % seq_len
    xs = inputx[CURRENT_SHIFT][t_idx]
    return jnp.zeros((MAX_T, X_PAD), jnp.float32).at[:, :X_DIM].set(xs)


@jax.jit
def sequence_forward_device(x_cursor, inputx, rand_draws, params):
    wih, whh, bg, w1h, w1x, b1, w2, b2, w3, b3 = params
    xs_pad = gather_inputs(x_cursor, inputx)
    x_arr = jnp.reshape(x_cursor, (1,)).astype(jnp.int32)
    return pl.pallas_call(
        fused_sequence_kernel,
        out_shape=(
            jax.ShapeDtypeStruct((MAX_T, H_PAD), jnp.float32),  # all step h_t
            jax.ShapeDtypeStruct((1, H_PAD), jnp.float32),      # outh
            jax.ShapeDtypeStruct((4,), jnp.int32),              # i_stop, total, count, _
        ),
        in_specs=[_smem(), _smem()] + [_vmem()] * 11,
        out_specs=(_vmem(), _vmem(), _smem()),
        scratch_shapes=[
            pltpu.VMEM((MAX_T, G_PAD), jnp.float32),  # hoisted x @ Wih + b
            pltpu.VMEM((1, H_PAD), jnp.float32),      # h state
            pltpu.VMEM((1, H_PAD), jnp.float32),      # c state
            pltpu.VMEM((1, 1), jnp.int32),            # stop-flag staging
            pltpu.SMEM((1,), jnp.int32),              # i_stop
        ],
    )(x_arr, rand_draws, xs_pad, wih, whh, bg, w1h, w1x, b1, w2, b2, w3, b3)


# ----------------------------------------------------------------------------
# Deterministic parameter init (padded / stacked layouts, pad regions == 0)
# ----------------------------------------------------------------------------
def init_params(key):
    ks = jax.random.split(key, 10)

    s = 1.0 / (H_DIM ** 0.5)
    wih = jax.random.uniform(ks[0], (4, X_DIM, H_DIM), jnp.float32, -s, s)
    whh = jax.random.uniform(ks[1], (4, H_DIM, H_DIM), jnp.float32, -s, s)
    b_ih = jax.random.uniform(ks[2], (4, H_DIM), jnp.float32, -s, s)
    b_hh = jax.random.uniform(ks[3], (4, H_DIM), jnp.float32, -s, s)

    wih_p = jnp.zeros((X_PAD, G_PAD), jnp.float32)
    whh_p = jnp.zeros((H_PAD, G_PAD), jnp.float32)
    bg_p = jnp.zeros((1, G_PAD), jnp.float32)
    for g in range(4):                     # PyTorch gate order: i, f, g, o
        c0 = g * H_PAD
        wih_p = wih_p.at[:X_DIM, c0:c0 + H_DIM].set(wih[g])
        whh_p = whh_p.at[:H_DIM, c0:c0 + H_DIM].set(whh[g])
        bg_p = bg_p.at[0, c0:c0 + H_DIM].set(b_ih[g] + b_hh[g])

    s1 = 1.0 / ((X_DIM + H_DIM) ** 0.5)
    s2 = 1.0 / (H2_DIM ** 0.5)
    s3 = 1.0 / (H3_DIM ** 0.5)
    w1 = jax.random.uniform(ks[4], (X_DIM + H_DIM, H2_DIM), jnp.float32, -s1, s1)
    b1 = jax.random.uniform(ks[5], (H2_DIM,), jnp.float32, -s1, s1)
    w2 = jax.random.uniform(ks[6], (H2_DIM, H3_DIM), jnp.float32, -s2, s2)
    b2 = jax.random.uniform(ks[7], (H3_DIM,), jnp.float32, -s2, s2)
    w3 = jax.random.uniform(ks[8], (H3_DIM, N_CLS), jnp.float32, -s3, s3)
    b3 = jax.random.uniform(ks[9], (N_CLS,), jnp.float32, -s3, s3)

    # fc1 input is cat(h_t, x_t): rows 0..149 multiply h, rows 150..299 multiply x
    w1h_p = jnp.zeros((H_PAD, S1_PAD), jnp.float32).at[:H_DIM, :H2_DIM].set(w1[:H_DIM])
    w1x_p = jnp.zeros((X_PAD, S1_PAD), jnp.float32).at[:X_DIM, :H2_DIM].set(w1[H_DIM:])
    b1_p = jnp.zeros((1, S1_PAD), jnp.float32).at[0, :H2_DIM].set(b1)
    w2_p = jnp.zeros((S1_PAD, S2_PAD), jnp.float32).at[:H2_DIM, :H3_DIM].set(w2)
    b2_p = jnp.zeros((1, S2_PAD), jnp.float32).at[0, :H3_DIM].set(b2)
    w3_p = jnp.zeros((S2_PAD, S3_PAD), jnp.float32).at[:H3_DIM, :N_CLS].set(w3)
    b3_p = jnp.zeros((1, S3_PAD), jnp.float32).at[0, :N_CLS].set(b3)

    return (wih_p, whh_p, bg_p, w1h_p, w1x_p, b1_p, w2_p, b2_p, w3_p, b3_p)


# ----------------------------------------------------------------------------
# Plain-JAX reference recurrence (for numerics validation only)
# ----------------------------------------------------------------------------
def reference_hidden_states(xs_pad, params, n_steps):
    wih, whh, bg, *_ = params
    xproj = xs_pad @ wih + bg
    h = jnp.zeros((1, H_PAD), jnp.float32)
    c = jnp.zeros((1, H_PAD), jnp.float32)
    hs = []
    for t in range(n_steps):
        gates = xproj[t:t + 1] + h @ whh
        i_g = jax.nn.sigmoid(gates[:, 0 * H_PAD:1 * H_PAD])
        f_g = jax.nn.sigmoid(gates[:, 1 * H_PAD:2 * H_PAD])
        g_g = jnp.tanh(gates[:, 2 * H_PAD:3 * H_PAD])
        o_g = jax.nn.sigmoid(gates[:, 3 * H_PAD:4 * H_PAD])
        c = f_g * c + i_g * g_g
        h = o_g * jnp.tanh(c)
        hs.append(h)
    return jnp.concatenate(hs, axis=0)


if __name__ == "__main__":
    key = jax.random.PRNGKey(0)
    k_inp, k_par = jax.random.split(key)

    # inputx: [num_shifts, seq_len, x_dim]; the module indexes inputx[3][t]
    NUM_SHIFTS, SEQ_LEN = 4, 48
    inputx = jax.random.normal(k_inp, (NUM_SHIFTS, SEQ_LEN, X_DIM), jnp.float32)
    params = init_params(k_par)

    x = 40  # the integer "x" argument of Sequence.forward (sequence cursor)

    # Pre-sample the phase-1 uniforms once (same seed / order as the original
    # per-step random.random() calls).  The kernel consumes only the first
    # i_stop of them, so the early-stop control flow matches the PyTorch module.
    py_rng = random.Random(0)
    rand_host = np.zeros((MAX_T,), np.float32)
    for t in range(MAX_PHASE1):
        rand_host[t] = py_rng.random()
    rand_draws = jnp.asarray(rand_host)
    # TODO(synk): the original prints y[0][0] when it breaks; that host-side
    # print side-effect is not reproduced.

    out_all, outh, stats = sequence_forward_device(
        jnp.int32(x), inputx, rand_draws, params)
    jax.block_until_ready(out_all)

    stats = np.asarray(stats)  # single device->host sync for the scalar results
    i_stop, total, count = int(stats[0]), int(stats[1]), int(stats[2])

    outputs = out_all[:total, :H_DIM]   # the module's `outputs` list, stacked
    outh = outh[:, :H_DIM]

    # --- sanity / numerics checks against a plain-JAX recurrence -------------
    assert 1 <= i_stop <= MAX_PHASE1
    assert total == i_stop + max(0, min(MAX_PHASE2, x - i_stop))
    assert count == i_stop + 9
    assert outh.shape == (1, H_DIM) and outputs.shape == (total, H_DIM)

    xs_pad = gather_inputs(jnp.int32(x), inputx)
    ref_h = reference_hidden_states(xs_pad, params, total)
    np.testing.assert_allclose(np.asarray(outputs),
                               np.asarray(ref_h[:, :H_DIM]),
                               rtol=5e-3, atol=5e-3)
    np.testing.assert_allclose(np.asarray(outh),
                               np.asarray(ref_h[i_stop - 1:i_stop, :H_DIM]),
                               rtol=5e-3, atol=5e-3)
    assert np.all(np.isfinite(np.asarray(outputs)))

    print("KERNEL_OK")
</pallas_src>

<mosaic_0001>
module attributes {stable_mosaic.version = 11 : i64} {
  func.func @fused_sequence_kernel(%arg0: memref<1xi32, #tpu.memory_space<smem>>, %arg1: memref<40xf32, #tpu.memory_space<smem>>, %arg2: memref<40x256xf32, #tpu.memory_space<vmem>>, %arg3: memref<256x1024xf32, #tpu.memory_space<vmem>>, %arg4: memref<256x1024xf32, #tpu.memory_space<vmem>>, %arg5: memref<1x1024xf32, #tpu.memory_space<vmem>>, %arg6: memref<256x128xf32, #tpu.memory_space<vmem>>, %arg7: memref<256x128xf32, #tpu.memory_space<vmem>>, %arg8: memref<1x128xf32, #tpu.memory_space<vmem>>, %arg9: memref<128x128xf32, #tpu.memory_space<vmem>>, %arg10: memref<1x128xf32, #tpu.memory_space<vmem>>, %arg11: memref<128x128xf32, #tpu.memory_space<vmem>>, %arg12: memref<1x128xf32, #tpu.memory_space<vmem>>, %arg13: memref<40x256xf32, #tpu.memory_space<vmem>>, %arg14: memref<1x256xf32, #tpu.memory_space<vmem>>, %arg15: memref<4xi32, #tpu.memory_space<smem>>, %arg16: memref<40x1024xf32, #tpu.memory_space<vmem>>, %arg17: memref<1x256xf32, #tpu.memory_space<vmem>>, %arg18: memref<1x256xf32, #tpu.memory_space<vmem>>, %arg19: memref<1x1xi32, #tpu.memory_space<vmem>>, %arg20: memref<1xi32, #tpu.memory_space<smem>>) attributes {dimension_semantics = [], scalar_prefetch = 0 : i64, scratch_operands = 5 : i64, tpu.core_type = #tpu.core_type<tc>} {
    %c0 = arith.constant 0 : index
    %c0_0 = arith.constant 0 : index
    %0 = vector.load %arg2[%c0, %c0_0] : memref<40x256xf32, #tpu.memory_space<vmem>>, vector<40x256xf32>
    %c0_1 = arith.constant 0 : index
    %c0_2 = arith.constant 0 : index
    %1 = vector.load %arg3[%c0_1, %c0_2] : memref<256x1024xf32, #tpu.memory_space<vmem>>, vector<256x1024xf32>
    %cst = arith.constant dense<0.000000e+00> : vector<40x1024xf32>
    %2 = tpu.matmul %0, %1, %cst {dimension_numbers = #tpu.dot_dimension_numbers<[1], [0], [0], [1], [0, 0, 1, 1], [], []>} : vector<40x256xf32>, vector<256x1024xf32>, vector<40x1024xf32> -> vector<40x1024xf32>
    %c0_3 = arith.constant 0 : index
    %c0_4 = arith.constant 0 : index
    %3 = vector.load %arg5[%c0_3, %c0_4] : memref<1x1024xf32, #tpu.memory_space<vmem>>, vector<1x1024xf32>
    %4 = vector.broadcast %3 : vector<1x1024xf32> to vector<40x1024xf32>
    %5 = arith.addf %2, %4 : vector<40x1024xf32>
    %c0_5 = arith.constant 0 : index
    %c0_6 = arith.constant 0 : index
    %6 = vector.load %arg16[%c0_5, %c0_6] : memref<40x1024xf32, #tpu.memory_space<vmem>>, vector<40x1024xf32>
    tpu.vector_store %arg16[%c0_5, %c0_6], %5 {strides = array<i32>} : memref<40x1024xf32, #tpu.memory_space<vmem>>, vector<40x1024xf32>,
    %cst_7 = arith.constant 0.000000e+00 : f32
    %7 = vector.broadcast %cst_7 : f32 to vector<1x256xf32>
    %c0_8 = arith.constant 0 : index
    %c0_9 = arith.constant 0 : index
    %8 = vector.load %arg17[%c0_8, %c0_9] : memref<1x256xf32, #tpu.memory_space<vmem>>, vector<1x256xf32>
    tpu.vector_store %arg17[%c0_8, %c0_9], %7 {strides = array<i32>} : memref<1x256xf32, #tpu.memory_space<vmem>>, vector<1x256xf32>,
    %cst_10 = arith.constant 0.000000e+00 : f32
    %9 = vector.broadcast %cst_10 : f32 to vector<1x256xf32>
    %c0_11 = arith.constant 0 : index
    %c0_12 = arith.constant 0 : index
    %10 = vector.load %arg18[%c0_11, %c0_12] : memref<1x256xf32, #tpu.memory_space<vmem>>, vector<1x256xf32>
    tpu.vector_store %arg18[%c0_11, %c0_12], %9 {strides = array<i32>} : memref<1x256xf32, #tpu.memory_space<vmem>>, vector<1x256xf32>,
    %c-1_i32 = arith.constant -1 : i32
    %c0_13 = arith.constant 0 : index
    %11 = memref.load %arg20[%c0_13] : memref<1xi32, #tpu.memory_space<smem>>
    memref.store %c-1_i32, %arg20[%c0_13] : memref<1xi32, #tpu.memory_space<smem>>
    %c0_14 = arith.constant 0 : index
    %12 = memref.load %arg0[%c0_14] : memref<1xi32, #tpu.memory_space<smem>>
    %13 = tpu.iota {dimensions = array<i32: 1>} : vector<1x128xi32>
    %c2_i32 = arith.constant 2 : i32
    %14 = vector.broadcast %c2_i32 : i32 to vector<1x128xi32>
    %15 = arith.cmpi slt, %13, %14 : vector<1x128xi32>
    %c0_i32 = arith.constant 0 : i32
    %16 = vector.broadcast %c0_i32 : i32 to vector<1x128xi32>
    %17 = arith.cmpi eq, %13, %16 : vector<1x128xi32>
    %c0_i32_15 = arith.constant 0 : i32
    %c40_i32 = arith.constant 40 : i32
    %18 = arith.addi %c0_i32_15, %c40_i32 : i32
    %c1_i32 = arith.constant 1 : i32
    scf.for %arg21 = %c0_i32_15 to %18 step %c1_i32  : i32 {
      %c0_25 = arith.constant 0 : index
      %33 = memref.load %arg20[%c0_25] : memref<1xi32, #tpu.memory_space<smem>>
      %c0_i32_26 = arith.constant 0 : i32
      %34 = arith.cmpi slt, %33, %c0_i32_26 : i32
      %35 = arith.subi %12, %33 : i32
      %c10_i32_27 = arith.constant 10 : i32
      %36 = arith.minsi %c10_i32_27, %35 : i32
      %c0_i32_28 = arith.constant 0 : i32
      %37 = arith.maxsi %c0_i32_28, %36 : i32
      %c30_i32 = arith.constant 30 : i32
      %38 = arith.cmpi slt, %arg21, %c30_i32 : i32
      %39 = arith.addi %33, %37 : i32
      %40 = arith.cmpi slt, %arg21, %39 : i32
      %41 = arith.select %34, %38, %40 : i1
      %c0_29 = arith.constant 0 : index
      %c0_30 = arith.constant 0 : index
      %42 = vector.load %arg17[%c0_29, %c0_30] : memref<1x256xf32, #tpu.memory_space<vmem>>, vector<1x256xf32>
      %c0_31 = arith.constant 0 : index
      %c0_32 = arith.constant 0 : index
      %43 = vector.load %arg18[%c0_31, %c0_32] : memref<1x256xf32, #tpu.memory_space<vmem>>, vector<1x256xf32>
      %44 = arith.index_cast %arg21 : i32 to index
      %c0_33 = arith.constant 0 : index
      %45 = vector.load %arg16[%44, %c0_33] : memref<40x1024xf32, #tpu.memory_space<vmem>>, vector<1x1024xf32>
      %c0_34 = arith.constant 0 : index
      %c0_35 = arith.constant 0 : index
      %46 = vector.load %arg4[%c0_34, %c0_35] : memref<256x1024xf32, #tpu.memory_space<vmem>>, vector<256x1024xf32>
      %cst_36 = arith.constant dense<0.000000e+00> : vector<1x1024xf32>
      %47 = tpu.matmul %42, %46, %cst_36 {dimension_numbers = #tpu.dot_dimension_numbers<[1], [0], [0], [1], [0, 0, 1, 1], [], []>} : vector<1x256xf32>, vector<256x1024xf32>, vector<1x1024xf32> -> vector<1x1024xf32>
      %48 = arith.addf %45, %47 : vector<1x1024xf32>
      %49 = vector.extract_strided_slice %48 {offsets = [0, 0], sizes = [1, 256], strides = [1, 1]} : vector<1x1024xf32> to vector<1x256xf32>
      %50 = arith.negf %49 : vector<1x256xf32>
      %51 = math.exp %50 : vector<1x256xf32>
      %cst_37 = arith.constant 1.000000e+00 : f32
      %52 = vector.broadcast %cst_37 : f32 to vector<1x256xf32>
      %53 = arith.addf %52, %51 : vector<1x256xf32>
      %54 = arith.divf %52, %53 : vector<1x256xf32>
      %55 = vector.extract_strided_slice %48 {offsets = [0, 256], sizes = [1, 256], strides = [1, 1]} : vector<1x1024xf32> to vector<1x256xf32>
      %56 = arith.negf %55 : vector<1x256xf32>
      %57 = math.exp %56 : vector<1x256xf32>
      %cst_38 = arith.constant 1.000000e+00 : f32
      %58 = vector.broadcast %cst_38 : f32 to vector<1x256xf32>
      %59 = arith.addf %58, %57 : vector<1x256xf32>
      %60 = arith.divf %58, %59 : vector<1x256xf32>
      %61 = vector.extract_strided_slice %48 {offsets = [0, 512], sizes = [1, 256], strides = [1, 1]} : vector<1x1024xf32> to vector<1x256xf32>
      %62 = math.tanh %61 : vector<1x256xf32>
      %63 = vector.extract_strided_slice %48 {offsets = [0, 768], sizes = [1, 256], strides = [1, 1]} : vector<1x1024xf32> to vector<1x256xf32>
      %64 = arith.negf %63 : vector<1x256xf32>
      %65 = math.exp %64 : vector<1x256xf32>
      %cst_39 = arith.constant 1.000000e+00 : f32
      %66 = vector.broadcast %cst_39 : f32 to vector<1x256xf32>
      %67 = arith.addf %66, %65 : vector<1x256xf32>
      %68 = arith.divf %66, %67 : vector<1x256xf32>
      %69 = arith.mulf %60, %43 : vector<1x256xf32>
      %70 = arith.mulf %54, %62 : vector<1x256xf32>
      %71 = arith.addf %69, %70 : vector<1x256xf32>
      %72 = math.tanh %71 : vector<1x256xf32>
      %73 = arith.mulf %68, %72 : vector<1x256xf32>
      %74 = arith.index_cast %arg21 : i32 to index
      %c0_40 = arith.constant 0 : index
      %75 = vector.load %arg2[%74, %c0_40] : memref<40x256xf32, #tpu.memory_space<vmem>>, vector<1x256xf32>
      %c0_41 = arith.constant 0 : index
      %c0_42 = arith.constant 0 : index
      %76 = vector.load %arg6[%c0_41, %c0_42] : memref<256x128xf32, #tpu.memory_space<vmem>>, vector<256x128xf32>
      %cst_43 = arith.constant dense<0.000000e+00> : vector<1x128xf32>
      %77 = tpu.matmul %73, %76, %cst_43 {dimension_numbers = #tpu.dot_dimension_numbers<[1], [0], [0], [1], [0, 0, 1, 1], [], []>} : vector<1x256xf32>, vector<256x128xf32>, vector<1x128xf32> -> vector<1x128xf32>
      %c0_44 = arith.constant 0 : index
      %c0_45 = arith.constant 0 : index
      %78 = vector.load %arg7[%c0_44, %c0_45] : memref<256x128xf32, #tpu.memory_space<vmem>>, vector<256x128xf32>
      %cst_46 = arith.constant dense<0.000000e+00> : vector<1x128xf32>
      %79 = tpu.matmul %75, %78, %cst_46 {dimension_numbers = #tpu.dot_dimension_numbers<[1], [0], [0], [1], [0, 0, 1, 1], [], []>} : vector<1x256xf32>, vector<256x128xf32>, vector<1x128xf32> -> vector<1x128xf32>
      %80 = arith.addf %77, %79 : vector<1x128xf32>
      %c0_47 = arith.constant 0 : index
      %c0_48 = arith.constant 0 : index
      %81 = vector.load %arg8[%c0_47, %c0_48] : memref<1x128xf32, #tpu.memory_space<vmem>>, vector<1x128xf32>
      %82 = arith.addf %80, %81 : vector<1x128xf32>
      %cst_49 = arith.constant 0.000000e+00 : f32
      %83 = vector.broadcast %cst_49 : f32 to vector<1x128xf32>
      %84 = arith.maximumf %82, %83 : vector<1x128xf32>
      %c0_50 = arith.constant 0 : index
      %c0_51 = arith.constant 0 : index
      %85 = vector.load %arg9[%c0_50, %c0_51] : memref<128x128xf32, #tpu.memory_space<vmem>>, vector<128x128xf32>
      %cst_52 = arith.constant dense<0.000000e+00> : vector<1x128xf32>
      %86 = tpu.matmul %84, %85, %cst_52 {dimension_numbers = #tpu.dot_dimension_numbers<[1], [0], [0], [1], [0, 0, 1, 1], [], []>} : vector<1x128xf32>, vector<128x128xf32>, vector<1x128xf32> -> vector<1x128xf32>
      %c0_53 = arith.constant 0 : index
      %c0_54 = arith.constant 0 : index
      %87 = vector.load %arg10[%c0_53, %c0_54] : memref<1x128xf32, #tpu.memory_space<vmem>>, vector<1x128xf32>
      %88 = arith.addf %86, %87 : vector<1x128xf32>
      %cst_55 = arith.constant 0.000000e+00 : f32
      %89 = vector.broadcast %cst_55 : f32 to vector<1x128xf32>
      %90 = arith.maximumf %88, %89 : vector<1x128xf32>
      %c0_56 = arith.constant 0 : index
      %c0_57 = arith.constant 0 : index
      %91 = vector.load %arg11[%c0_56, %c0_57] : memref<128x128xf32, #tpu.memory_space<vmem>>, vector<128x128xf32>
      %cst_58 = arith.constant dense<0.000000e+00> : vector<1x128xf32>
      %92 = tpu.matmul %90, %91, %cst_58 {dimension_numbers = #tpu.dot_dimension_numbers<[1], [0], [0], [1], [0, 0, 1, 1], [], []>} : vector<1x128xf32>, vector<128x128xf32>, vector<1x128xf32> -> vector<1x128xf32>
      %c0_59 = arith.constant 0 : index
      %c0_60 = arith.constant 0 : index
      %93 = vector.load %arg12[%c0_59, %c0_60] : memref<1x128xf32, #tpu.memory_space<vmem>>, vector<1x128xf32>
      %94 = arith.addf %92, %93 : vector<1x128xf32>
      %cst_61 = arith.constant 0.000000e+00 : f32
      %95 = vector.broadcast %cst_61 : f32 to vector<1x128xf32>
      %96 = arith.maximumf %94, %95 : vector<1x128xf32>
      %cst_62 = arith.constant 0xFF800000 : f32
      %97 = vector.broadcast %cst_62 : f32 to vector<1x128xf32>
      %98 = arith.select %15, %96, %97 : vector<1x128xi1>, vector<1x128xf32>
      %cst_63 = arith.constant dense<0xFF800000> : vector<1xf32>
      %99 = vector.multi_reduction <maximumf>, %98, %cst_63 [1] : vector<1x128xf32> to vector<1xf32>
      %100 = vector.shape_cast %99 : vector<1xf32> to vector<1x1xf32>
      %101 = vector.broadcast %100 : vector<1x1xf32> to vector<1x128xf32>
      %102 = arith.subf %96, %101 : vector<1x128xf32>
      %103 = math.exp %102 : vector<1x128xf32>
      %cst_64 = arith.constant 0.000000e+00 : f32
      %104 = vector.broadcast %cst_64 : f32 to vector<1x128xf32>
      %105 = arith.select %15, %103, %104 : vector<1x128xi1>, vector<1x128xf32>
      %cst_65 = arith.constant 0.000000e+00 : f32
      %106 = vector.broadcast %cst_65 : f32 to vector<1x128xf32>
      %107 = arith.select %17, %105, %106 : vector<1x128xi1>, vector<1x128xf32>
      %cst_66 = arith.constant dense<0.000000e+00> : vector<1xf32>
      %108 = vector.multi_reduction <add>, %107, %cst_66 [1] : vector<1x128xf32> to vector<1xf32>
      %109 = vector.shape_cast %108 : vector<1xf32> to vector<1x1xf32>
      %cst_67 = arith.constant dense<0.000000e+00> : vector<1xf32>
      %110 = vector.multi_reduction <add>, %105, %cst_67 [1] : vector<1x128xf32> to vector<1xf32>
      %111 = vector.shape_cast %110 : vector<1xf32> to vector<1x1xf32>
      %112 = arith.index_cast %arg21 : i32 to index
      %113 = memref.load %arg1[%112] : memref<40xf32, #tpu.memory_space<smem>>
      %114 = vector.broadcast %113 : f32 to vector<1x1xf32>
      %115 = arith.mulf %114, %111 : vector<1x1xf32>
      %116 = arith.cmpf ogt, %115, %109 : vector<1x1xf32>
      %117 = arith.extui %116 : vector<1x1xi1> to vector<1x1xi32>
      %c0_68 = arith.constant 0 : index
      %c0_69 = arith.constant 0 : index
      %118 = vector.load %arg19[%c0_68, %c0_69] : memref<1x1xi32, #tpu.memory_space<vmem>>, vector<1x1xi32>
      tpu.vector_store %arg19[%c0_68, %c0_69], %117 {strides = array<i32>} : memref<1x1xi32, #tpu.memory_space<vmem>>, vector<1x1xi32>,
      %c0_70 = arith.constant 0 : index
      %c0_71 = arith.constant 0 : index
      %119 = vector.load %arg19[%c0_70, %c0_71] : memref<1x1xi32, #tpu.memory_space<vmem>>, vector<1x1xi32>
      %120 = vector.extract %119[0, 0] : i32 from vector<1x1xi32>
      %c0_i32_72 = arith.constant 0 : i32
      %121 = arith.cmpi sgt, %120, %c0_i32_72 : i32
      %122 = arith.select %41, %73, %42 : vector<1x256xf32>
      %c0_73 = arith.constant 0 : index
      %c0_74 = arith.constant 0 : index
      %123 = vector.load %arg17[%c0_73, %c0_74] : memref<1x256xf32, #tpu.memory_space<vmem>>, vector<1x256xf32>
      tpu.vector_store %arg17[%c0_73, %c0_74], %122 {strides = array<i32>} : memref<1x256xf32, #tpu.memory_space<vmem>>, vector<1x256xf32>,
      %124 = arith.select %41, %71, %43 : vector<1x256xf32>
      %c0_75 = arith.constant 0 : index
      %c0_76 = arith.constant 0 : index
      %125 = vector.load %arg18[%c0_75, %c0_76] : memref<1x256xf32, #tpu.memory_space<vmem>>, vector<1x256xf32>
      tpu.vector_store %arg18[%c0_75, %c0_76], %124 {strides = array<i32>} : memref<1x256xf32, #tpu.memory_space<vmem>>, vector<1x256xf32>,
      %cst_77 = arith.constant 0.000000e+00 : f32
      %126 = vector.broadcast %cst_77 : f32 to vector<1x256xf32>
      %127 = arith.select %41, %73, %126 : vector<1x256xf32>
      %128 = arith.index_cast %arg21 : i32 to index
      %c0_78 = arith.constant 0 : index
      %129 = vector.load %arg13[%128, %c0_78] : memref<40x256xf32, #tpu.memory_space<vmem>>, vector<1x256xf32>
      tpu.vector_store %arg13[%128, %c0_78], %127 {strides = array<i32>} : memref<40x256xf32, #tpu.memory_space<vmem>>, vector<1x256xf32>,
      %130 = arith.andi %34, %41 : i1
      %131 = arith.andi %130, %121 : i1
      %c29_i32 = arith.constant 29 : i32
      %132 = arith.cmpi eq, %arg21, %c29_i32 : i32
      %133 = arith.andi %130, %132 : i1
      %c1_i32_79 = arith.constant 1 : i32
      %134 = arith.addi %arg21, %c1_i32_79 : i32
      %c30_i32_80 = arith.constant 30 : i32
      %135 = arith.select %133, %c30_i32_80, %33 : i32
      %136 = arith.select %131, %134, %135 : i32
      %c0_81 = arith.constant 0 : index
      %137 = memref.load %arg20[%c0_81] : memref<1xi32, #tpu.memory_space<smem>>
      memref.store %136, %arg20[%c0_81] : memref<1xi32, #tpu.memory_space<smem>>
    }
    %c40_i32_16 = arith.constant 40 : i32
    %c0_17 = arith.constant 0 : index
    %19 = memref.load %arg20[%c0_17] : memref<1xi32, #tpu.memory_space<smem>>
    %20 = arith.subi %12, %19 : i32
    %c10_i32 = arith.constant 10 : i32
    %21 = arith.minsi %c10_i32, %20 : i32
    %c0_i32_18 = arith.constant 0 : i32
    %22 = arith.maxsi %c0_i32_18, %21 : i32
    %c1_i32_19 = arith.constant 1 : i32
    %23 = arith.subi %19, %c1_i32_19 : i32
    %24 = arith.index_cast %23 : i32 to index
    %c0_20 = arith.constant 0 : index
    %25 = vector.load %arg13[%24, %c0_20] : memref<40x256xf32, #tpu.memory_space<vmem>>, vector<1x256xf32>
    %c0_21 = arith.constant 0 : index
    %c0_22 = arith.constant 0 : index
    %26 = vector.load %arg14[%c0_21, %c0_22] : memref<1x256xf32, #tpu.memory_space<vmem>>, vector<1x256xf32>
    tpu.vector_store %arg14[%c0_21, %c0_22], %25 {strides = array<i32>} : memref<1x256xf32, #tpu.memory_space<vmem>>, vector<1x256xf32>,
    %c0_23 = arith.constant 0 : index
    %27 = memref.load %arg15[%c0_23] : memref<4xi32, #tpu.memory_space<smem>>
    memref.store %19, %arg15[%c0_23] : memref<4xi32, #tpu.memory_space<smem>>
    %28 = arith.addi %19, %22 : i32
    %c1 = arith.constant 1 : index
    %29 = memref.load %arg15[%c1] : memref<4xi32, #tpu.memory_space<smem>>
    memref.store %28, %arg15[%c1] : memref<4xi32, #tpu.memory_space<smem>>
    %c9_i32 = arith.constant 9 : i32
    %30 = arith.addi %19, %c9_i32 : i32
    %c2 = arith.constant 2 : index
    %31 = memref.load %arg15[%c2] : memref<4xi32, #tpu.memory_space<smem>>
    memref.store %30, %arg15[%c2] : memref<4xi32, #tpu.memory_space<smem>>
    %c40_i32_24 = arith.constant 40 : i32
    %c3 = arith.constant 3 : index
    %32 = memref.load %arg15[%c3] : memref<4xi32, #tpu.memory_space<smem>>
    memref.store %c40_i32_24, %arg15[%c3] : memref<4xi32, #tpu.memory_space<smem>>
    return
  }
}

</mosaic_0001>

<bundles_post_ra>
// kernel: sequence_forward_device.1
= control target key start
LH: loop header
LB: loop body
LE: loop exit
PB: predicated region body
PF: predicated region fallthrough
CT: control target
= control target key end

     0   :  { %22 = vsyncpa [#allocation12], 0  ;;  %s3101_s0 = inlined_call_operand.<no memory space> [shape: s32[1], index: 0, kind: input, shape index: {}]   ;;  %s3102_s1 = inlined_call_operand.vmem [shape: f32[40], index: 1, kind: input, shape index: {}]   ;;  %s3103_s2 = inlined_call_operand.vmem [shape: f32[40,256], index: 2, kind: input, shape index: {}]   ;;  %s3104_s3 = inlined_call_operand.hbm [shape: f32[256,1024], index: 3, kind: input, shape index: {}]   ;;  %s3105_s4 = inlined_call_operand.hbm [shape: f32[256,1024], index: 4, kind: input, shape index: {}]   ;;  %s3106_s5 = inlined_call_operand.vmem [shape: f32[1,1024], index: 5, kind: input, shape index: {}]   ;;  %s3107_s6 = inlined_call_operand.vmem [shape: f32[256,128], index: 6, kind: input, shape index: {}]   ;;  %s3108_s7 = inlined_call_operand.vmem [shape: f32[256,128], index: 7, kind: input, shape index: {}]   ;;  %s3109_s8 = inlined_call_operand.vmem [shape: f32[1,128], index: 8, kind: input, shape index: {}]   ;;  %s3110_s9 = inlined_call_operand.vmem [shape: f32[128,128], index: 9, kind: input, shape index: {}]   ;;  %s3111_s10 = inlined_call_operand.vmem [shape: f32[1,128], index: 10, kind: input, shape index: {}]   ;;  %s3112_s11 = inlined_call_operand.vmem [shape: f32[128,128], index: 11, kind: input, shape index: {}]   ;;  %s3113_s12 = inlined_call_operand.vmem [shape: f32[1,128], index: 12, kind: input, shape index: {}]   ;;  %s3114_s13 = inlined_call_operand.hbm [shape: f32[40,256], index: 13, kind: output, shape index: {0}]   ;;  %s3115_s14 = inlined_call_operand.hbm [shape: f32[1,256], index: 14, kind: output, shape index: {1}]   ;;  %s3116_s15 = inlined_call_operand.hbm [shape: s32[4], index: 15, kind: output, shape index: {2}]  }
   0x1   :  { %23 = vsyncpa [#allocation9], 0 }
   0x2   :  { %24 = vsyncpa [#allocation15], 0 }
   0x3   :  { %25 = vsyncpa [#allocation10], 0 }
   0x4   :  { %26 = vsyncpa [#allocation18], 0 }
   0x5   :  { %27 = vsyncpa [#allocation11], 0  ;;  %s36_s20 = sshll.u32 %s3102_s1, 4  ;;  %s37_s20 = int_to_ptr.vmem [resolvable:$true] %s36_s20 }
   0x6   :  { %s2304_s21 = scalar_lea.vmem %s37_s20, 16  ;;  %p2309_p1 = scmp.lt.s32.totalorder %s37_s20, %s37_s20 }
   0x7   :  { %p2305_p0 = scmp.ne.s32.totalorder %s37_s20, %s2304_s21  ;;  %p2310_p2 = scmp.lt.s32.totalorder %s2304_s21, %s2304_s21 }
   0x9   :  { %p2311_p3 = por %p2310_p2, %p2309_p1 }
   0xb   :  { %p2312_p4 = pnand %p2311_p3, %p2305_p0 }
   0xd   :  { %2315 = shalt.err (!%p2312_p4)
}
   0xe   :  { %s2424_s22 = smov [#allocation8]   ;;  %s2425_s23 = smov [#allocation13]  }
   0xf   :  { %39 = dma.vmem_to_smem %s37_s20, 16, %s2424_s22, [#allocation12]  }
  0x10   :  { %s47_s24 = sshll.u32 %s2425_s23, 4  ;;  %s48_s24 = int_to_ptr.vmem [resolvable:$true] %s47_s24 }
  0x11   :  { %s2324_s25 = scalar_lea.vmem %s48_s24, 32768  ;;  %p2329_p6 = scmp.lt.s32.totalorder %s48_s24, %s48_s24 }
  0x12   :  { %p2325_p5 = scmp.ne.s32.totalorder %s48_s24, %s2324_s25  ;;  %p2330_p7 = scmp.lt.s32.totalorder %s2324_s25, %s2324_s25 }
  0x14   :  { %p2331_p8 = por %p2330_p7, %p2329_p6 }
  0x16   :  { %p2332_p9 = pnand %p2331_p8, %p2325_p5 }
  0x18   :  { %2335 = shalt.err (!%p2332_p9)
}
  0x19   :  { %s2426_s1 = smov 1024   ;;  %s2427_s26 = smov 64  }
  0x1a   :  { %53 = dma.hbm_to_vmem [thread:$0]  %s3104_s3, 32768, %s48_s24, [#allocation9], %s2426_s1, %s2426_s1, %s2427_s26  }
  0x1b   :  { %s2428_s29 = smov [#allocation14]  }
  0x1c   :  { %s59_s30 = sshll.u32 %s2428_s29, 4  ;;  %s60_s30 = int_to_ptr.vmem [resolvable:$true] %s59_s30 }
  0x1d   :  { %s2344_s16 = scalar_lea.vmem %s60_s30, 32768  ;;  %p2349_p11 = scmp.lt.s32.totalorder %s60_s30, %s60_s30 }
  0x1e   :  { %p2345_p10 = scmp.ne.s32.totalorder %s60_s30, %s2344_s16  ;;  %p2350_p12 = scmp.lt.s32.totalorder %s2344_s16, %s2344_s16 }
  0x20   :  { %p2351_p13 = por %p2350_p12, %p2349_p11 }
  0x22   :  { %p2352_p0 = pnand %p2351_p13, %p2345_p10 }
  0x24   :  { %2355 = shalt.err (!%p2352_p0)
}
  0x25   :  { %65 = dma.hbm_to_vmem [thread:$0]  %s3105_s4, 32768, %s60_s30, [#allocation15], %s2426_s1, %s2426_s1, %s2427_s26  }
  0x26   :  { %2408 = dma.done.wait [#allocation12], 16  }
  0x27   :  { %2409 = vsyncadd [#allocation12], 4294967280 }
  0x28   :  { %2410 = dma.done.wait [#allocation9], 32768  }
  0x29   :  { %2411 = vsyncadd [#allocation9], 4294934528 }
  0x2a   :  { %2412 = dma.done.wait [#allocation15], 32768  }
  0x2b   :  { %2413 = vsyncadd [#allocation15], 4294934528 }
  0x2c   :  { %91 = sfence }
  0x2d   :  { %v223_v0 = vld [vmem:[#allocation13 + $0x3c8] sm:$0xff]  ;;  %v225_v1 = vld [vmem:[#allocation13 + $0x3d8] sm:$0xff]  ;;  %v222_v2 = vld [vmem:[#allocation13 + $0x3c0] sm:$0xff]  ;;  %s2430_s19 = smov 4294967295  }
  0x2e   :  { %400 = vmatprep.subr.mxu0 %v223_v0  ;;  %495 = vmatprep.subr.mxu1 %v225_v1  ;;  %v224_v3 = vld [vmem:[#allocation13 + $0x3d0] sm:$0xff]  ;;  %v215_v4 = vld [vmem:[#allocation13 + $0x388] sm:$0xff]  ;;  %v217_v5 = vld [vmem:[#allocation13 + $0x398] sm:$0xff]  ;;  %827 = sst [smem:[#allocation6]] %s2430_s19 }
  0x2f   :  { %401 = vmatpush1.msra.mxu0 %v222_v2  ;;  %496 = vmatpush1.msra.mxu1 %v224_v3  ;;  %v214_v6 = vld [vmem:[#allocation13 + $0x380] sm:$0xff]  ;;  %v216_v7 = vld [vmem:[#allocation13 + $0x390] sm:$0xff]  ;;  %v207_v8 = vld [vmem:[#allocation13 + $0x348] sm:$0xff] }
  0x30   :  { %402 = vmatprep.subr.mxu0 %v215_v4  ;;  %497 = vmatprep.subr.mxu1 %v217_v5  ;;  %v209_v9 = vld [vmem:[#allocation13 + $0x358] sm:$0xff]  ;;  %v206_v10 = vld [vmem:[#allocation13 + $0x340] sm:$0xff]  ;;  %v208_v11 = vld [vmem:[#allocation13 + $0x350] sm:$0xff] }
  0x31   :  { %403 = vmatpush1.msra.mxu0 %v214_v6  ;;  %498 = vmatpush1.msra.mxu1 %v216_v7  ;;  %v199_v12 = vld [vmem:[#allocation13 + $0x308] sm:$0xff]  ;;  %v201_v13 = vld [vmem:[#allocation13 + $0x318] sm:$0xff]  ;;  %v198_v14 = vld [vmem:[#allocation13 + $0x300] sm:$0xff] }
  0x32   :  { %404 = vmatprep.subr.mxu0 %v207_v8  ;;  %499 = vmatprep.subr.mxu1 %v209_v9  ;;  %v200_v15 = vld [vmem:[#allocation13 + $0x310] sm:$0xff]  ;;  %v191_v16 = vld [vmem:[#allocation13 + $0x2c8] sm:$0xff]  ;;  %v193_v17 = vld [vmem:[#allocation13 + $0x2d8] sm:$0xff] }
  0x33   :  { %405 = vmatpush1.msra.mxu0 %v206_v10  ;;  %500 = vmatpush1.msra.mxu1 %v208_v11  ;;  %v190_v18 = vld [vmem:[#allocation13 + $0x2c0] sm:$0xff]  ;;  %v192_v19 = vld [vmem:[#allocation13 + $0x2d0] sm:$0xff]  ;;  %v183_v20 = vld [vmem:[#allocation13 + $0x288] sm:$0xff] }
  0x34   :  { %406 = vmatprep.subr.mxu0 %v199_v12  ;;  %501 = vmatprep.subr.mxu1 %v201_v13  ;;  %v185_v21 = vld [vmem:[#allocation13 + $0x298] sm:$0xff]  ;;  %v182_v22 = vld [vmem:[#allocation13 + $0x280] sm:$0xff]  ;;  %v184_v23 = vld [vmem:[#allocation13 + $0x290] sm:$0xff] }
  0x35   :  { %407 = vmatpush1.msra.mxu0 %v198_v14  ;;  %502 = vmatpush1.msra.mxu1 %v200_v15  ;;  %v175_v24 = vld [vmem:[#allocation13 + $0x248] sm:$0xff]  ;;  %v177_v25 = vld [vmem:[#allocation13 + $0x258] sm:$0xff]  ;;  %v174_v26 = vld [vmem:[#allocation13 + $0x240] sm:$0xff] }
  0x36   :  { %408 = vmatprep.subr.mxu0 %v191_v16  ;;  %503 = vmatprep.subr.mxu1 %v193_v17  ;;  %v176_v27 = vld [vmem:[#allocation13 + $0x250] sm:$0xff]  ;;  %v167_v28 = vld [vmem:[#allocation13 + $0x208] sm:$0xff]  ;;  %v169_v29 = vld [vmem:[#allocation13 + $0x218] sm:$0xff] }
  0x37   :  { %409 = vmatpush1.msra.mxu0 %v190_v18  ;;  %504 = vmatpush1.msra.mxu1 %v192_v19  ;;  %v166_v30 = vld [vmem:[#allocation13 + $0x200] sm:$0xff]  ;;  %v168_v31 = vld [vmem:[#allocation13 + $0x210] sm:$0xff]  ;;  %v159_v32 = vld [vmem:[#allocation13 + $0x1c8] sm:$0xff] }
  0x38   :  { %410 = vmatprep.subr.mxu0 %v183_v20  ;;  %505 = vmatprep.subr.mxu1 %v185_v21  ;;  %v161_v33 = vld [vmem:[#allocation13 + $0x1d8] sm:$0xff]  ;;  %v158_v34 = vld [vmem:[#allocation13 + $0x1c0] sm:$0xff]  ;;  %v160_v35 = vld [vmem:[#allocation13 + $0x1d0] sm:$0xff] }
  0x39   :  { %411 = vmatpush1.msra.mxu0 %v182_v22  ;;  %506 = vmatpush1.msra.mxu1 %v184_v23  ;;  %v151_v36 = vld [vmem:[#allocation13 + $0x188] sm:$0xff]  ;;  %v153_v37 = vld [vmem:[#allocation13 + $0x198] sm:$0xff]  ;;  %v150_v38 = vld [vmem:[#allocation13 + $0x180] sm:$0xff] }
  0x3a   :  { %412 = vmatprep.subr.mxu0 %v175_v24  ;;  %507 = vmatprep.subr.mxu1 %v177_v25  ;;  %v152_v39 = vld [vmem:[#allocation13 + $0x190] sm:$0xff]  ;;  %v143_v40 = vld [vmem:[#allocation13 + $0x148] sm:$0xff]  ;;  %v145_v41 = vld [vmem:[#allocation13 + $0x158] sm:$0xff] }
  0x3b   :  { %413 = vmatpush1.msra.mxu0 %v174_v26  ;;  %508 = vmatpush1.msra.mxu1 %v176_v27  ;;  %v142_v42 = vld [vmem:[#allocation13 + $0x140] sm:$0xff]  ;;  %v144_v43 = vld [vmem:[#allocation13 + $0x150] sm:$0xff]  ;;  %v135_v44 = vld [vmem:[#allocation13 + $0x108] sm:$0xff] }
  0x3c   :  { %414 = vmatprep.subr.mxu0 %v167_v28  ;;  %509 = vmatprep.subr.mxu1 %v169_v29  ;;  %v137_v45 = vld [vmem:[#allocation13 + $0x118] sm:$0xff]  ;;  %v134_v46 = vld [vmem:[#allocation13 + $0x100] sm:$0xff]  ;;  %v136_v47 = vld [vmem:[#allocation13 + $0x110] sm:$0xff] }
  0x3d   :  { %415 = vmatpush1.msra.mxu0 %v166_v30  ;;  %510 = vmatpush1.msra.mxu1 %v168_v31  ;;  %v127_v48 = vld [vmem:[#allocation13 + $0xc8] sm:$0xff]  ;;  %v129_v49 = vld [vmem:[#allocation13 + $0xd8] sm:$0xff]  ;;  %v126_v50 = vld [vmem:[#allocation13 + $0xc0] sm:$0xff] }
  0x3e   :  { %416 = vmatprep.subr.mxu0 %v159_v32  ;;  %511 = vmatprep.subr.mxu1 %v161_v33  ;;  %v128_v51 = vld [vmem:[#allocation13 + $0xd0] sm:$0xff]  ;;  %v119_v52 = vld [vmem:[#allocation13 + $0x88] sm:$0xff]  ;;  %v121_v53 = vld [vmem:[#allocation13 + $0x98] sm:$0xff] }
  0x3f   :  { %417 = vmatpush1.msra.mxu0 %v158_v34  ;;  %512 = vmatpush1.msra.mxu1 %v160_v35  ;;  %v118_v54 = vld [vmem:[#allocation13 + $0x80] sm:$0xff]  ;;  %v120_v55 = vld [vmem:[#allocation13 + $0x90] sm:$0xff]  ;;  %v111_v56 = vld [vmem:[#allocation13 + $0x48] sm:$0xff] }
  0x40   :  { %418 = vmatprep.subr.mxu0 %v151_v36  ;;  %513 = vmatprep.subr.mxu1 %v153_v37  ;;  %v113_v57 = vld [vmem:[#allocation13 + $0x58] sm:$0xff]  ;;  %v110_v58 = vld [vmem:[#allocation13 + $0x40] sm:$0xff]  ;;  %v112_v59 = vld [vmem:[#allocation13 + $0x50] sm:$0xff] }
  0x41   :  { %419 = vmatpush1.msra.mxu0 %v150_v38  ;;  %514 = vmatpush1.msra.mxu1 %v152_v39  ;;  %v103_v60 = vld [vmem:[#allocation13 + $0x8] sm:$0xff]  ;;  %v105_v61 = vld [vmem:[#allocation13 + $0x18] sm:$0xff]  ;;  %v102_v62 = vld [vmem:[#allocation13] sm:$0xff] }
  0x42   :  { %420 = vmatprep.subr.mxu0 %v143_v40  ;;  %515 = vmatprep.subr.mxu1 %v145_v41  ;;  %v104_v63 = vld [vmem:[#allocation13 + $0x10] sm:$0xff]  ;;  %v351_v0 = vld [vmem:[#allocation13 + $0x7c8] sm:$0xff]  ;;  %v353_v1 = vld [vmem:[#allocation13 + $0x7d8] sm:$0xff] }
  0x43   :  { %421 = vmatpush1.msra.mxu0 %v142_v42  ;;  %516 = vmatpush1.msra.mxu1 %v144_v43  ;;  %v350_v2 = vld [vmem:[#allocation13 + $0x7c0] sm:$0xff]  ;;  %v352_v3 = vld [vmem:[#allocation13 + $0x7d0] sm:$0xff]  ;;  %v343_v4 = vld [vmem:[#allocation13 + $0x788] sm:$0xff] }
  0x44   :  { %422 = vmatprep.subr.mxu0 %v135_v44  ;;  %517 = vmatprep.subr.mxu1 %v137_v45  ;;  %v345_v5 = vld [vmem:[#allocation13 + $0x798] sm:$0xff]  ;;  %v342_v6 = vld [vmem:[#allocation13 + $0x780] sm:$0xff]  ;;  %v344_v7 = vld [vmem:[#allocation13 + $0x790] sm:$0xff] }
  0x45   :  { %423 = vmatpush1.msra.mxu0 %v134_v46  ;;  %518 = vmatpush1.msra.mxu1 %v136_v47  ;;  %v335_v8 = vld [vmem:[#allocation13 + $0x748] sm:$0xff]  ;;  %v337_v9 = vld [vmem:[#allocation13 + $0x758] sm:$0xff]  ;;  %v334_v10 = vld [vmem:[#allocation13 + $0x740] sm:$0xff] }
  0x46   :  { %424 = vmatprep.subr.mxu0 %v127_v48  ;;  %519 = vmatprep.subr.mxu1 %v129_v49  ;;  %v336_v11 = vld [vmem:[#allocation13 + $0x750] sm:$0xff]  ;;  %v327_v12 = vld [vmem:[#allocation13 + $0x708] sm:$0xff]  ;;  %v329_v13 = vld [vmem:[#allocation13 + $0x718] sm:$0xff] }
  0x47   :  { %425 = vmatpush1.msra.mxu0 %v126_v50  ;;  %520 = vmatpush1.msra.mxu1 %v128_v51  ;;  %v326_v14 = vld [vmem:[#allocation13 + $0x700] sm:$0xff]  ;;  %v328_v15 = vld [vmem:[#allocation13 + $0x710] sm:$0xff]  ;;  %v319_v16 = vld [vmem:[#allocation13 + $0x6c8] sm:$0xff] }
  0x48   :  { %426 = vmatprep.subr.mxu0 %v119_v52  ;;  %521 = vmatprep.subr.mxu1 %v121_v53  ;;  %v321_v17 = vld [vmem:[#allocation13 + $0x6d8] sm:$0xff]  ;;  %v318_v18 = vld [vmem:[#allocation13 + $0x6c0] sm:$0xff]  ;;  %v320_v19 = vld [vmem:[#allocation13 + $0x6d0] sm:$0xff] }
  0x49   :  { %427 = vmatpush1.msra.mxu0 %v118_v54  ;;  %522 = vmatpush1.msra.mxu1 %v120_v55  ;;  %v311_v20 = vld [vmem:[#allocation13 + $0x688] sm:$0xff]  ;;  %v313_v21 = vld [vmem:[#allocation13 + $0x698] sm:$0xff]  ;;  %v310_v22 = vld [vmem:[#allocation13 + $0x680] sm:$0xff] }
  0x4a   :  { %428 = vmatprep.subr.mxu0 %v111_v56  ;;  %523 = vmatprep.subr.mxu1 %v113_v57  ;;  %v312_v23 = vld [vmem:[#allocation13 + $0x690] sm:$0xff]  ;;  %v303_v24 = vld [vmem:[#allocation13 + $0x648] sm:$0xff]  ;;  %v305_v25 = vld [vmem:[#allocation13 + $0x658] sm:$0xff] }
  0x4b   :  { %429 = vmatpush1.msra.mxu0 %v110_v58  ;;  %524 = vmatpush1.msra.mxu1 %v112_v59  ;;  %v302_v26 = vld [vmem:[#allocation13 + $0x640] sm:$0xff]  ;;  %v304_v27 = vld [vmem:[#allocation13 + $0x650] sm:$0xff]  ;;  %v295_v28 = vld [vmem:[#allocation13 + $0x608] sm:$0xff] }
  0x4c   :  { %430 = vmatprep.subr.mxu0 %v103_v60  ;;  %525 = vmatprep.subr.mxu1 %v105_v61  ;;  %v297_v29 = vld [vmem:[#allocation13 + $0x618] sm:$0xff]  ;;  %v294_v30 = vld [vmem:[#allocation13 + $0x600] sm:$0xff]  ;;  %v296_v31 = vld [vmem:[#allocation13 + $0x610] sm:$0xff] }
  0x4d   :  { %431 = vmatpush1.msra.mxu0 %v102_v62  ;;  %526 = vmatpush1.msra.mxu1 %v104_v63  ;;  %v287_v32 = vld [vmem:[#allocation13 + $0x5c8] sm:$0xff]  ;;  %v289_v33 = vld [vmem:[#allocation13 + $0x5d8] sm:$0xff]  ;;  %v286_v34 = vld [vmem:[#allocation13 + $0x5c0] sm:$0xff] }
  0x4e   :  { %432 = vmatprep.subr.mxu0 %v351_v0  ;;  %527 = vmatprep.subr.mxu1 %v353_v1  ;;  %v288_v35 = vld [vmem:[#allocation13 + $0x5d0] sm:$0xff]  ;;  %v279_v36 = vld [vmem:[#allocation13 + $0x588] sm:$0xff]  ;;  %v281_v37 = vld [vmem:[#allocation13 + $0x598] sm:$0xff] }
  0x4f   :  { %433 = vmatpush2.msra.mxu0 %v350_v2  ;;  %528 = vmatpush2.msra.mxu1 %v352_v3  ;;  %v278_v38 = vld [vmem:[#allocation13 + $0x580] sm:$0xff]  ;;  %v280_v39 = vld [vmem:[#allocation13 + $0x590] sm:$0xff]  ;;  %v271_v40 = vld [vmem:[#allocation13 + $0x548] sm:$0xff] }
  0x50   :  { %434 = vmatprep.subr.mxu0 %v343_v4  ;;  %529 = vmatprep.subr.mxu1 %v345_v5  ;;  %v273_v41 = vld [vmem:[#allocation13 + $0x558] sm:$0xff]  ;;  %v270_v42 = vld [vmem:[#allocation13 + $0x540] sm:$0xff]  ;;  %v272_v43 = vld [vmem:[#allocation13 + $0x550] sm:$0xff] }
  0x51   :  { %435 = vmatpush2.msra.mxu0 %v342_v6  ;;  %530 = vmatpush2.msra.mxu1 %v344_v7  ;;  %v263_v44 = vld [vmem:[#allocation13 + $0x508] sm:$0xff]  ;;  %v265_v45 = vld [vmem:[#allocation13 + $0x518] sm:$0xff]  ;;  %v262_v46 = vld [vmem:[#allocation13 + $0x500] sm:$0xff] }
  0x52   :  { %436 = vmatprep.subr.mxu0 %v335_v8  ;;  %531 = vmatprep.subr.mxu1 %v337_v9  ;;  %v264_v47 = vld [vmem:[#allocation13 + $0x510] sm:$0xff]  ;;  %v255_v48 = vld [vmem:[#allocation13 + $0x4c8] sm:$0xff]  ;;  %v257_v49 = vld [vmem:[#allocation13 + $0x4d8] sm:$0xff] }
  0x53   :  { %437 = vmatpush2.msra.mxu0 %v334_v10  ;;  %532 = vmatpush2.msra.mxu1 %v336_v11  ;;  %v254_v50 = vld [vmem:[#allocation13 + $0x4c0] sm:$0xff]  ;;  %v256_v51 = vld [vmem:[#allocation13 + $0x4d0] sm:$0xff]  ;;  %v247_v52 = vld [vmem:[#allocation13 + $0x488] sm:$0xff] }
  0x54   :  { %438 = vmatprep.subr.mxu0 %v327_v12  ;;  %533 = vmatprep.subr.mxu1 %v329_v13  ;;  %v249_v53 = vld [vmem:[#allocation13 + $0x498] sm:$0xff]  ;;  %v246_v54 = vld [vmem:[#allocation13 + $0x480] sm:$0xff]  ;;  %v248_v55 = vld [vmem:[#allocation13 + $0x490] sm:$0xff] }
  0x55   :  { %439 = vmatpush2.msra.mxu0 %v326_v14  ;;  %534 = vmatpush2.msra.mxu1 %v328_v15  ;;  %v239_v56 = vld [vmem:[#allocation13 + $0x448] sm:$0xff]  ;;  %v241_v57 = vld [vmem:[#allocation13 + $0x458] sm:$0xff]  ;;  %v238_v58 = vld [vmem:[#allocation13 + $0x440] sm:$0xff] }
  0x56   :  { %440 = vmatprep.subr.mxu0 %v319_v16  ;;  %535 = vmatprep.subr.mxu1 %v321_v17  ;;  %v240_v59 = vld [vmem:[#allocation13 + $0x450] sm:$0xff]  ;;  %v231_v60 = vld [vmem:[#allocation13 + $0x408] sm:$0xff]  ;;  %v233_v61 = vld [vmem:[#allocation13 + $0x418] sm:$0xff] }
  0x57   :  { %441 = vmatpush2.msra.mxu0 %v318_v18  ;;  %536 = vmatpush2.msra.mxu1 %v320_v19  ;;  %v230_v62 = vld [vmem:[#allocation13 + $0x400] sm:$0xff]  ;;  %v232_v0 = vld [vmem:[#allocation13 + $0x410] sm:$0xff]  ;;  %v227_v2 = vld [vmem:[#allocation13 + $0x3e8] sm:$0xff] }
  0x58   :  { %442 = vmatprep.subr.mxu0 %v311_v20  ;;  %537 = vmatprep.subr.mxu1 %v313_v21  ;;  %v2533_v63 = vld [vmem:[%s3103_s2 + $0x8] sm:$0xff]  ;;  %v2538_v1 = vld [vmem:[%s3103_s2] sm:$0xff]  ;;  %v228_v5 = vld [vmem:[#allocation13 + $0x3f0] sm:$0xff] }
  0x59   :  { %443 = vmatpush2.msra.mxu0 %v310_v22  ;;  %538 = vmatpush2.msra.mxu1 %v312_v23  ;;  %v229_v3 = vld [vmem:[#allocation13 + $0x3f8] sm:$0xff]  ;;  %v226_v4 = vld [vmem:[#allocation13 + $0x3e0] sm:$0xff]  ;;  %v219_v6 = vld [vmem:[#allocation13 + $0x3a8] sm:$0xff] }
  0x5a   :  { %444 = vmatprep.subr.mxu0 %v303_v24  ;;  %539 = vmatprep.subr.mxu1 %v305_v25  ;;  %v221_v7 = vld [vmem:[#allocation13 + $0x3b8] sm:$0xff]  ;;  %v218_v8 = vld [vmem:[#allocation13 + $0x3a0] sm:$0xff]  ;;  %v220_v9 = vld [vmem:[#allocation13 + $0x3b0] sm:$0xff] }
  0x5b   :  { %445 = vmatpush2.msra.mxu0 %v302_v26  ;;  %540 = vmatpush2.msra.mxu1 %v304_v27  ;;  %v211_v10 = vld [vmem:[#allocation13 + $0x368] sm:$0xff]  ;;  %v213_v11 = vld [vmem:[#allocation13 + $0x378] sm:$0xff]  ;;  %v210_v12 = vld [vmem:[#allocation13 + $0x360] sm:$0xff] }
  0x5c   :  { %446 = vmatprep.subr.mxu0 %v295_v28  ;;  %541 = vmatprep.subr.mxu1 %v297_v29  ;;  %v212_v13 = vld [vmem:[#allocation13 + $0x370] sm:$0xff]  ;;  %v203_v14 = vld [vmem:[#allocation13 + $0x328] sm:$0xff]  ;;  %v205_v15 = vld [vmem:[#allocation13 + $0x338] sm:$0xff] }
  0x5d   :  { %447 = vmatpush2.msra.mxu0 %v294_v30  ;;  %542 = vmatpush2.msra.mxu1 %v296_v31  ;;  %v202_v16 = vld [vmem:[#allocation13 + $0x320] sm:$0xff]  ;;  %v204_v17 = vld [vmem:[#allocation13 + $0x330] sm:$0xff]  ;;  %v195_v18 = vld [vmem:[#allocation13 + $0x2e8] sm:$0xff] }
  0x5e   :  { %448 = vmatprep.subr.mxu0 %v287_v32  ;;  %543 = vmatprep.subr.mxu1 %v289_v33  ;;  %v197_v19 = vld [vmem:[#allocation13 + $0x2f8] sm:$0xff]  ;;  %v194_v20 = vld [vmem:[#allocation13 + $0x2e0] sm:$0xff]  ;;  %v196_v21 = vld [vmem:[#allocation13 + $0x2f0] sm:$0xff] }
  0x5f   :  { %449 = vmatpush2.msra.mxu0 %v286_v34  ;;  %544 = vmatpush2.msra.mxu1 %v288_v35  ;;  %v187_v22 = vld [vmem:[#allocation13 + $0x2a8] sm:$0xff]  ;;  %v189_v23 = vld [vmem:[#allocation13 + $0x2b8] sm:$0xff]  ;;  %v186_v24 = vld [vmem:[#allocation13 + $0x2a0] sm:$0xff] }
  0x60   :  { %450 = vmatprep.subr.mxu0 %v279_v36  ;;  %545 = vmatprep.subr.mxu1 %v281_v37  ;;  %v188_v25 = vld [vmem:[#allocation13 + $0x2b0] sm:$0xff]  ;;  %v179_v26 = vld [vmem:[#allocation13 + $0x268] sm:$0xff]  ;;  %v181_v27 = vld [vmem:[#allocation13 + $0x278] sm:$0xff] }
  0x61   :  { %451 = vmatpush2.msra.mxu0 %v278_v38  ;;  %546 = vmatpush2.msra.mxu1 %v280_v39  ;;  %v178_v28 = vld [vmem:[#allocation13 + $0x260] sm:$0xff]  ;;  %v180_v29 = vld [vmem:[#allocation13 + $0x270] sm:$0xff]  ;;  %v171_v30 = vld [vmem:[#allocation13 + $0x228] sm:$0xff] }
  0x62   :  { %452 = vmatprep.subr.mxu0 %v271_v40  ;;  %547 = vmatprep.subr.mxu1 %v273_v41  ;;  %v173_v31 = vld [vmem:[#allocation13 + $0x238] sm:$0xff]  ;;  %v170_v32 = vld [vmem:[#allocation13 + $0x220] sm:$0xff]  ;;  %v172_v33 = vld [vmem:[#allocation13 + $0x230] sm:$0xff] }
  0x63   :  { %453 = vmatpush2.msra.mxu0 %v270_v42  ;;  %548 = vmatpush2.msra.mxu1 %v272_v43  ;;  %v163_v34 = vld [vmem:[#allocation13 + $0x1e8] sm:$0xff]  ;;  %v165_v35 = vld [vmem:[#allocation13 + $0x1f8] sm:$0xff]  ;;  %v162_v36 = vld [vmem:[#allocation13 + $0x1e0] sm:$0xff] }
  0x64   :  { %454 = vmatprep.subr.mxu0 %v263_v44  ;;  %549 = vmatprep.subr.mxu1 %v265_v45  ;;  %v164_v37 = vld [vmem:[#allocation13 + $0x1f0] sm:$0xff]  ;;  %v155_v38 = vld [vmem:[#allocation13 + $0x1a8] sm:$0xff]  ;;  %v157_v39 = vld [vmem:[#allocation13 + $0x1b8] sm:$0xff] }
  0x65   :  { %455 = vmatpush2.msra.mxu0 %v262_v46  ;;  %550 = vmatpush2.msra.mxu1 %v264_v47  ;;  %v154_v40 = vld [vmem:[#allocation13 + $0x1a0] sm:$0xff]  ;;  %v156_v41 = vld [vmem:[#allocation13 + $0x1b0] sm:$0xff]  ;;  %v147_v42 = vld [vmem:[#allocation13 + $0x168] sm:$0xff] }
  0x66   :  { %456 = vmatprep.subr.mxu0 %v255_v48  ;;  %551 = vmatprep.subr.mxu1 %v257_v49  ;;  %v149_v43 = vld [vmem:[#allocation13 + $0x178] sm:$0xff]  ;;  %v146_v44 = vld [vmem:[#allocation13 + $0x160] sm:$0xff]  ;;  %v148_v45 = vld [vmem:[#allocation13 + $0x170] sm:$0xff] }
  0x67   :  { %457 = vmatpush2.msra.mxu0 %v254_v50  ;;  %552 = vmatpush2.msra.mxu1 %v256_v51  ;;  %v139_v46 = vld [vmem:[#allocation13 + $0x128] sm:$0xff]  ;;  %v141_v47 = vld [vmem:[#allocation13 + $0x138] sm:$0xff]  ;;  %v138_v48 = vld [vmem:[#allocation13 + $0x120] sm:$0xff] }
  0x68   :  { %458 = vmatprep.subr.mxu0 %v247_v52  ;;  %553 = vmatprep.subr.mxu1 %v249_v53  ;;  %v140_v49 = vld [vmem:[#allocation13 + $0x130] sm:$0xff]  ;;  %v131_v50 = vld [vmem:[#allocation13 + $0xe8] sm:$0xff]  ;;  %v133_v51 = vld [vmem:[#allocation13 + $0xf8] sm:$0xff] }
  0x69   :  { %459 = vmatpush2.msra.mxu0 %v246_v54  ;;  %554 = vmatpush2.msra.mxu1 %v248_v55  ;;  %v130_v52 = vld [vmem:[#allocation13 + $0xe0] sm:$0xff]  ;;  %v132_v53 = vld [vmem:[#allocation13 + $0xf0] sm:$0xff]  ;;  %v123_v54 = vld [vmem:[#allocation13 + $0xa8] sm:$0xff] }
  0x6a   :  { %460 = vmatprep.subr.mxu0 %v239_v56  ;;  %555 = vmatprep.subr.mxu1 %v241_v57  ;;  %v125_v55 = vld [vmem:[#allocation13 + $0xb8] sm:$0xff]  ;;  %v122_v56 = vld [vmem:[#allocation13 + $0xa0] sm:$0xff]  ;;  %v124_v57 = vld [vmem:[#allocation13 + $0xb0] sm:$0xff] }
  0x6b   :  { %461 = vmatpush2.msra.mxu0 %v238_v58  ;;  %556 = vmatpush2.msra.mxu1 %v240_v59  ;;  %v115_v58 = vld [vmem:[#allocation13 + $0x68] sm:$0xff]  ;;  %v117_v59 = vld [vmem:[#allocation13 + $0x78] sm:$0xff] }
  0x6c   :  { %462 = vmatprep.subr.mxu0 %v231_v60  ;;  %557 = vmatprep.subr.mxu1 %v233_v61  ;;  %v114_v60 = vld [vmem:[#allocation13 + $0x60] sm:$0xff]  ;;  %v116_v61 = vld [vmem:[#allocation13 + $0x70] sm:$0xff] }
  0x6d   :  { %463 = vmatpush2.msra.mxu0 %v230_v62  ;;  %464 = vmatprep.mubr.f32.mxu0 %v2533_v63  ;;  %v107_v62 = vld [vmem:[#allocation13 + $0x28] sm:$0xff] }
  0x6e   :  { %558 = vmatpush2.msra.mxu1 %v232_v0  ;;  %559 = vmatprep.mubr.f32.mxu1 %v2533_v63  ;;  %v109_v0 = vld [vmem:[#allocation13 + $0x38] sm:$0xff] }
  0x6f   :  { %465 = vmatmul.mubr.f32.vlgmr.msra.gmra.mxu0 %v2538_v1  ;;  %560 = vmatmul.mubr.f32.vlgmr.msra.gmra.mxu1 %v2538_v1 }
  0x70   :  { %590 = vmatprep.subr.mxu0 %v227_v2  ;;  %685 = vmatprep.subr.mxu1 %v229_v3  ;;  %v106_v2 = vld [vmem:[#allocation13 + $0x20] sm:$0xff]  ;;  %v108_v3 = vld [vmem:[#allocation13 + $0x30] sm:$0xff] }
  0x71   :  { %591 = vmatpush1.msra.mxu0 %v226_v4  ;;  %686 = vmatpush1.msra.mxu1 %v228_v5  ;;  %v355_v4 = vld [vmem:[#allocation13 + $0x7e8] sm:$0xff]  ;;  %v357_v5 = vld [vmem:[#allocation13 + $0x7f8] sm:$0xff] }
  0x72   :  { %592 = vmatprep.subr.mxu0 %v219_v6  ;;  %687 = vmatprep.subr.mxu1 %v221_v7  ;;  %v354_v6 = vld [vmem:[#allocation13 + $0x7e0] sm:$0xff]  ;;  %v356_v7 = vld [vmem:[#allocation13 + $0x7f0] sm:$0xff] }
  0x73   :  { %593 = vmatpush1.msra.mxu0 %v218_v8  ;;  %688 = vmatpush1.msra.mxu1 %v220_v9  ;;  %v347_v8 = vld [vmem:[#allocation13 + $0x7a8] sm:$0xff]  ;;  %v349_v9 = vld [vmem:[#allocation13 + $0x7b8] sm:$0xff] }
  0x74   :  { %594 = vmatprep.subr.mxu0 %v211_v10  ;;  %689 = vmatprep.subr.mxu1 %v213_v11  ;;  %v346_v10 = vld [vmem:[#allocation13 + $0x7a0] sm:$0xff]  ;;  %v348_v11 = vld [vmem:[#allocation13 + $0x7b0] sm:$0xff] }
  0x75   :  { %595 = vmatpush1.msra.mxu0 %v210_v12  ;;  %690 = vmatpush1.msra.mxu1 %v212_v13  ;;  %v339_v12 = vld [vmem:[#allocation13 + $0x768] sm:$0xff]  ;;  %v341_v13 = vld [vmem:[#allocation13 + $0x778] sm:$0xff] }
  0x76   :  { %596 = vmatprep.subr.mxu0 %v203_v14  ;;  %691 = vmatprep.subr.mxu1 %v205_v15  ;;  %v338_v14 = vld [vmem:[#allocation13 + $0x760] sm:$0xff]  ;;  %v340_v15 = vld [vmem:[#allocation13 + $0x770] sm:$0xff] }
  0x77   :  { %597 = vmatpush1.msra.mxu0 %v202_v16  ;;  %692 = vmatpush1.msra.mxu1 %v204_v17  ;;  %v331_v16 = vld [vmem:[#allocation13 + $0x728] sm:$0xff]  ;;  %v333_v17 = vld [vmem:[#allocation13 + $0x738] sm:$0xff] }
  0x78   :  { %598 = vmatprep.subr.mxu0 %v195_v18  ;;  %693 = vmatprep.subr.mxu1 %v197_v19  ;;  %v330_v18 = vld [vmem:[#allocation13 + $0x720] sm:$0xff]  ;;  %v332_v19 = vld [vmem:[#allocation13 + $0x730] sm:$0xff] }
  0x79   :  { %599 = vmatpush1.msra.mxu0 %v194_v20  ;;  %694 = vmatpush1.msra.mxu1 %v196_v21  ;;  %v323_v20 = vld [vmem:[#allocation13 + $0x6e8] sm:$0xff]  ;;  %v325_v21 = vld [vmem:[#allocation13 + $0x6f8] sm:$0xff] }
  0x7a   :  { %600 = vmatprep.subr.mxu0 %v187_v22  ;;  %695 = vmatprep.subr.mxu1 %v189_v23  ;;  %v322_v22 = vld [vmem:[#allocation13 + $0x6e0] sm:$0xff]  ;;  %v324_v23 = vld [vmem:[#allocation13 + $0x6f0] sm:$0xff] }
  0x7b   :  { %601 = vmatpush1.msra.mxu0 %v186_v24  ;;  %696 = vmatpush1.msra.mxu1 %v188_v25  ;;  %v315_v24 = vld [vmem:[#allocation13 + $0x6a8] sm:$0xff]  ;;  %v317_v25 = vld [vmem:[#allocation13 + $0x6b8] sm:$0xff] }
  0x7c   :  { %602 = vmatprep.subr.mxu0 %v179_v26  ;;  %697 = vmatprep.subr.mxu1 %v181_v27  ;;  %v314_v26 = vld [vmem:[#allocation13 + $0x6a0] sm:$0xff]  ;;  %v316_v27 = vld [vmem:[#allocation13 + $0x6b0] sm:$0xff] }
  0x7d   :  { %603 = vmatpush1.msra.mxu0 %v178_v28  ;;  %698 = vmatpush1.msra.mxu1 %v180_v29  ;;  %v307_v28 = vld [vmem:[#allocation13 + $0x668] sm:$0xff]  ;;  %v309_v29 = vld [vmem:[#allocation13 + $0x678] sm:$0xff] }
  0x7e   :  { %604 = vmatprep.subr.mxu0 %v171_v30  ;;  %699 = vmatprep.subr.mxu1 %v173_v31  ;;  %v2547_v30 = vld [vmem:[%s3103_s2 + $0x18] sm:$0xff]  ;;  %v306_v31 = vld [vmem:[#allocation13 + $0x660] sm:$0xff] }
  0x7f   :  { %605 = vmatpush1.msra.mxu0 %v170_v32  ;;  %700 = vmatpush1.msra.mxu1 %v172_v33  ;;  %v308_v32 = vld [vmem:[#allocation13 + $0x670] sm:$0xff] }
  0x80   :  { %606 = vmatprep.subr.mxu0 %v163_v34  ;;  %701 = vmatprep.subr.mxu1 %v165_v35  ;;  %v2552_v33 = vld [vmem:[%s3103_s2 + $0x10] sm:$0xff]  ;;  %v301_v35 = vld [vmem:[#allocation13 + $0x638] sm:$0xff] }
  0x81   :  { %607 = vmatpush1.msra.mxu0 %v162_v36  ;;  %702 = vmatpush1.msra.mxu1 %v164_v37  ;;  %v299_v34 = vld [vmem:[#allocation13 + $0x628] sm:$0xff]  ;;  %v298_v36 = vld [vmem:[#allocation13 + $0x620] sm:$0xff]  ;;  %v300_v37 = vld [vmem:[#allocation13 + $0x630] sm:$0xff] }
  0x82   :  { %608 = vmatprep.subr.mxu0 %v155_v38  ;;  %703 = vmatprep.subr.mxu1 %v157_v39  ;;  %v291_v38 = vld [vmem:[#allocation13 + $0x5e8] sm:$0xff]  ;;  %v293_v39 = vld [vmem:[#allocation13 + $0x5f8] sm:$0xff] }
  0x83   :  { %609 = vmatpush1.msra.mxu0 %v154_v40  ;;  %704 = vmatpush1.msra.mxu1 %v156_v41  ;;  %v2561_v40 = vld [vmem:[%s3103_s2 + $0x28] sm:$0xff] }
  0x84   :  { %610 = vmatprep.subr.mxu0 %v147_v42  ;;  %705 = vmatprep.subr.mxu1 %v149_v43  ;;  %v290_v41 = vld [vmem:[#allocation13 + $0x5e0] sm:$0xff]  ;;  %v292_v42 = vld [vmem:[#allocation13 + $0x5f0] sm:$0xff] }
  0x85   :  { %611 = vmatpush1.msra.mxu0 %v146_v44  ;;  %706 = vmatpush1.msra.mxu1 %v148_v45  ;;  %v2566_v43 = vld [vmem:[%s3103_s2 + $0x20] sm:$0xff]  ;;  %v283_v44 = vld [vmem:[#allocation13 + $0x5a8] sm:$0xff] }
  0x86   :  { %612 = vmatprep.subr.mxu0 %v139_v46  ;;  %707 = vmatprep.subr.mxu1 %v141_v47  ;;  %v285_v45 = vld [vmem:[#allocation13 + $0x5b8] sm:$0xff]  ;;  %v282_v46 = vld [vmem:[#allocation13 + $0x5a0] sm:$0xff]  ;;  %v284_v47 = vld [vmem:[#allocation13 + $0x5b0] sm:$0xff] }
  0x87   :  { %613 = vmatpush1.msra.mxu0 %v138_v48  ;;  %708 = vmatpush1.msra.mxu1 %v140_v49  ;;  %v275_v48 = vld [vmem:[#allocation13 + $0x568] sm:$0xff]  ;;  %v277_v49 = vld [vmem:[#allocation13 + $0x578] sm:$0xff] }
  0x88   :  { %614 = vmatprep.subr.mxu0 %v131_v50  ;;  %709 = vmatprep.subr.mxu1 %v133_v51  ;;  %v2575_v50 = vld [vmem:[%s3103_s2 + $0x38] sm:$0xff]  ;;  %v274_v51 = vld [vmem:[#allocation13 + $0x560] sm:$0xff] }
  0x89   :  { %615 = vmatpush1.msra.mxu0 %v130_v52  ;;  %710 = vmatpush1.msra.mxu1 %v132_v53  ;;  %v276_v52 = vld [vmem:[#allocation13 + $0x570] sm:$0xff] }
  0x8a   :  { %616 = vmatprep.subr.mxu0 %v123_v54  ;;  %711 = vmatprep.subr.mxu1 %v125_v55  ;;  %v2580_v53 = vld [vmem:[%s3103_s2 + $0x30] sm:$0xff]  ;;  %v269_v55 = vld [vmem:[#allocation13 + $0x538] sm:$0xff] }
  0x8b   :  { %617 = vmatpush1.msra.mxu0 %v122_v56  ;;  %712 = vmatpush1.msra.mxu1 %v124_v57  ;;  %v267_v54 = vld [vmem:[#allocation13 + $0x528] sm:$0xff]  ;;  %v266_v56 = vld [vmem:[#allocation13 + $0x520] sm:$0xff]  ;;  %v268_v57 = vld [vmem:[#allocation13 + $0x530] sm:$0xff] }
  0x8c   :  { %618 = vmatprep.subr.mxu0 %v115_v58  ;;  %713 = vmatprep.subr.mxu1 %v117_v59  ;;  %v259_v58 = vld [vmem:[#allocation13 + $0x4e8] sm:$0xff]  ;;  %v261_v59 = vld [vmem:[#allocation13 + $0x4f8] sm:$0xff] }
  0x8d   :  { %619 = vmatpush1.msra.mxu0 %v114_v60  ;;  %714 = vmatpush1.msra.mxu1 %v116_v61  ;;  %v101_v60 = vld [vmem:[%s3103_s2 + $0x48] sm:$0xff] }
  0x8e   :  { %620 = vmatprep.subr.mxu0 %v107_v62  ;;  %715 = vmatprep.subr.mxu1 %v109_v0  ;;  %v258_v61 = vld [vmem:[#allocation13 + $0x4e0] sm:$0xff]  ;;  %v260_v62 = vld [vmem:[#allocation13 + $0x4f0] sm:$0xff] }
  0x8f   :  { %621 = vmatpush1.msra.mxu0 %v106_v2  ;;  %716 = vmatpush1.msra.mxu1 %v108_v3  ;;  %v100_v0 = vld [vmem:[%s3103_s2 + $0x40] sm:$0xff]  ;;  %v251_v2 = vld [vmem:[#allocation13 + $0x4a8] sm:$0xff] }
  0x90   :  { %622 = vmatprep.subr.mxu0 %v355_v4  ;;  %717 = vmatprep.subr.mxu1 %v357_v5  ;;  %v253_v3 = vld [vmem:[#allocation13 + $0x4b8] sm:$0xff]  ;;  %v250_v4 = vld [vmem:[#allocation13 + $0x4a0] sm:$0xff]  ;;  %v252_v5 = vld [vmem:[#allocation13 + $0x4b0] sm:$0xff] }
  0x91   :  { %623 = vmatpush2.msra.mxu0 %v354_v6  ;;  %718 = vmatpush2.msra.mxu1 %v356_v7  ;;  %v360_v6 = vlaneseq  ;;  %v243_v7 = vld [vmem:[#allocation13 + $0x468] sm:$0xff] }
  0x92   :  { %624 = vmatprep.subr.mxu0 %v347_v8  ;;  %719 = vmatprep.subr.mxu1 %v349_v9  ;;  %v245_v8 = vld [vmem:[#allocation13 + $0x478] sm:$0xff]  ;;  %v242_v9 = vld [vmem:[#allocation13 + $0x460] sm:$0xff] }
  0x93   :  { %625 = vmatpush2.msra.mxu0 %v346_v10  ;;  %720 = vmatpush2.msra.mxu1 %v348_v11  ;;  %v244_v10 = vld [vmem:[#allocation13 + $0x470] sm:$0xff]  ;;  %vm2592_vm0 = vcmp.lt.s32.totalorder %v360_v6, 256 }
  0x94   :  { %626 = vmatprep.subr.mxu0 %v339_v12  ;;  %721 = vmatprep.subr.mxu1 %v341_v13  ;;  %v2596_v12 = vand.u32 127, %v360_v6  ;;  %v235_v13 = vld [vmem:[#allocation13 + $0x428] sm:$0xff] }
  0x95   :  { %627 = vmatpush2.msra.mxu0 %v338_v14  ;;  %722 = vmatpush2.msra.mxu1 %v340_v15  ;;  %v237_v14 = vld [vmem:[#allocation13 + $0x438] sm:$0xff]  ;;  %v2429_v15 = vmov 0.0  }
  0x96   :  { %628 = vmatprep.subr.mxu0 %v331_v16  ;;  %723 = vmatprep.subr.mxu1 %v333_v17  ;;  %824 = vst.msk [vmem:[#allocation3] sm:$0x3] %vm2592_vm0, %v2429_v15  ;;  %825 = vst.msk [vmem:[#allocation4] sm:$0x3] %vm2592_vm0, %v2429_v15  ;;  %v234_v16 = vld [vmem:[#allocation13 + $0x420] sm:$0xff]  ;;  %vm831_vm1 = vcmp.lt.s32.totalorder %v2596_v12, 2 }
  0x97   :  { %629 = vmatpush2.msra.mxu0 %v330_v18  ;;  %724 = vmatpush2.msra.mxu1 %v332_v19  ;;  %vm832_vm2 = vcmp.eq.s32.totalorder %v2596_v12, 0  ;;  %v236_v17 = vld [vmem:[#allocation13 + $0x430] sm:$0xff]  ;;  %v2629_v19 = vld [vmem:[%s3106_s5] sm:$0xff]  ;;  %s2649_s5 = smov 0  }
  0x98   :  { %630 = vmatprep.subr.mxu0 %v323_v20  ;;  %725 = vmatprep.subr.mxu1 %v325_v21 }
  0x99   :  { %631 = vmatpush2.msra.mxu0 %v322_v22  ;;  %726 = vmatpush2.msra.mxu1 %v324_v23 }
  0x9a   :  { %632 = vmatprep.subr.mxu0 %v315_v24  ;;  %727 = vmatprep.subr.mxu1 %v317_v25 }
  0x9b   :  { %633 = vmatpush2.msra.mxu0 %v314_v26  ;;  %728 = vmatpush2.msra.mxu1 %v316_v27 }
  0x9c   :  { %634 = vmatprep.subr.mxu0 %v307_v28  ;;  %729 = vmatprep.subr.mxu1 %v309_v29 }
  0x9d   :  { %470 = vmatprep.mubr.f32.mxu0 %v2547_v30  ;;  %565 = vmatprep.mubr.f32.mxu1 %v2547_v30 }
  0x9e   :  { %635 = vmatpush2.msra.mxu0 %v306_v31  ;;  %730 = vmatpush2.msra.mxu1 %v308_v32 }
  0x9f   :  { %471 = vmatmul.mubr.f32.gmra.mxu0 %v2552_v33  ;;  %566 = vmatmul.mubr.f32.gmra.mxu1 %v2552_v33 }
  0xa0   :  { %636 = vmatprep.subr.mxu0 %v299_v34  ;;  %731 = vmatprep.subr.mxu1 %v301_v35 }
  0xa1   :  { %637 = vmatpush2.msra.mxu0 %v298_v36  ;;  %732 = vmatpush2.msra.mxu1 %v300_v37 }
  0xa2   :  { %638 = vmatprep.subr.mxu0 %v291_v38  ;;  %733 = vmatprep.subr.mxu1 %v293_v39 }
  0xa3   :  { %476 = vmatprep.mubr.f32.mxu0 %v2561_v40  ;;  %571 = vmatprep.mubr.f32.mxu1 %v2561_v40 }
  0xa4   :  { %639 = vmatpush2.msra.mxu0 %v290_v41  ;;  %734 = vmatpush2.msra.mxu1 %v292_v42 }
  0xa5   :  { %477 = vmatmul.mubr.f32.gmra.mxu0 %v2566_v43  ;;  %572 = vmatmul.mubr.f32.gmra.mxu1 %v2566_v43 }
  0xa6   :  { %640 = vmatprep.subr.mxu0 %v283_v44  ;;  %735 = vmatprep.subr.mxu1 %v285_v45 }
  0xa7   :  { %641 = vmatpush2.msra.mxu0 %v282_v46  ;;  %736 = vmatpush2.msra.mxu1 %v284_v47 }
  0xa8   :  { %642 = vmatprep.subr.mxu0 %v275_v48  ;;  %737 = vmatprep.subr.mxu1 %v277_v49 }
  0xa9   :  { %482 = vmatprep.mubr.f32.mxu0 %v2575_v50  ;;  %577 = vmatprep.mubr.f32.mxu1 %v2575_v50 }
  0xaa   :  { %643 = vmatpush2.msra.mxu0 %v274_v51  ;;  %738 = vmatpush2.msra.mxu1 %v276_v52 }
  0xab   :  { %483 = vmatmul.mubr.f32.gmra.mxu0 %v2580_v53  ;;  %578 = vmatmul.mubr.f32.gmra.mxu1 %v2580_v53 }
  0xac   :  { %644 = vmatprep.subr.mxu0 %v267_v54  ;;  %739 = vmatprep.subr.mxu1 %v269_v55 }
  0xad   :  { %645 = vmatpush2.msra.mxu0 %v266_v56  ;;  %740 = vmatpush2.msra.mxu1 %v268_v57 }
  0xae   :  { %646 = vmatprep.subr.mxu0 %v259_v58  ;;  %741 = vmatprep.subr.mxu1 %v261_v59 }
  0xaf   :  { %488 = vmatprep.mubr.f32.mxu0 %v101_v60  ;;  %583 = vmatprep.mubr.f32.mxu1 %v101_v60 }
  0xb0   :  { %647 = vmatpush2.msra.mxu0 %v258_v61  ;;  %742 = vmatpush2.msra.mxu1 %v260_v62 }
  0xb1   :  { %489 = vmatmul.mubr.f32.gmra.mxu0 %v100_v0  ;;  %584 = vmatmul.mubr.f32.gmra.mxu1 %v100_v0 }
  0xb2   :  { %648 = vmatprep.subr.mxu0 %v251_v2  ;;  %743 = vmatprep.subr.mxu1 %v253_v3 }
  0xb3   :  { %649 = vmatpush2.msra.mxu0 %v250_v4  ;;  %744 = vmatpush2.msra.mxu1 %v252_v5 }
  0xb4   :  { %650 = vmatprep.subr.mxu0 %v243_v7  ;;  %745 = vmatprep.subr.mxu1 %v245_v8 }
  0xb5   :  { %651 = vmatpush2.msra.mxu0 %v242_v9  ;;  %746 = vmatpush2.msra.mxu1 %v244_v10 }
  0xb6   :  { %652 = vmatprep.subr.mxu0 %v235_v13  ;;  %747 = vmatprep.subr.mxu1 %v237_v14 }
  0xb7   :  { %653 = vmatpush2.msra.mxu0 %v234_v16  ;;  %654 = vmatprep.mubr.f32.mxu0 %v2533_v63 }
  0xb8   :  { %748 = vmatpush2.msra.mxu1 %v236_v17  ;;  %749 = vmatprep.mubr.f32.mxu1 %v2533_v63  ;;  %v2620_v63 = vshrl.u32 %v360_v6, 7 }
  0xb9   :  { %655 = vmatmul.mubr.f32.vlgmr.msra.gmra.mxu0 %v2538_v1  ;;  %750 = vmatmul.mubr.f32.vlgmr.msra.gmra.mxu1 %v2538_v1 }
  0xba   :  { %660 = vmatprep.mubr.f32.mxu0 %v2547_v30  ;;  %755 = vmatprep.mubr.f32.mxu1 %v2547_v30  ;;  %v2623_v1 = vsub.s32 0, %v2620_v63  ;;  %v370_v18 = vsub.s32 2, %v2620_v63  ;;  %v2632_v20 = vsub.s32 1, %v2620_v63  ;;  %v374_v21 = vsub.s32 3, %v2620_v63 }
  0xbb   :  { %v378_v62 = vsub.s32 4, %v2620_v63  ;;  %v382_v6 = vsub.s32 5, %v2620_v63  ;;  %v390_v7 = vsub.s32 7, %v2620_v63 }
  0xbc   :  { %v363_v22 = vrot.slane %v2629_v19, %v2623_v1  ;;  %v371_v23 = vrot.slane %v2629_v19, %v370_v18  ;;  %v367_v24 = vrot.slane %v2629_v19, %v2632_v20  ;;  %v375_v25 = vrot.slane %v2629_v19, %v374_v21 }
  0xbd   :  { %661 = vmatmul.mubr.f32.gmra.mxu0 %v2552_v33  ;;  %756 = vmatmul.mubr.f32.gmra.mxu1 %v2552_v33  ;;  %v379_v8 = vrot.slane %v2629_v19, %v378_v62  ;;  %v383_v10 = vrot.slane %v2629_v19, %v382_v6  ;;  %v391_v13 = vrot.slane %v2629_v19, %v390_v7 }
  0xbe   :  { %666 = vmatprep.mubr.f32.mxu0 %v2561_v40  ;;  %761 = vmatprep.mubr.f32.mxu1 %v2561_v40 }
  0xc1   :  { %667 = vmatmul.mubr.f32.gmra.mxu0 %v2566_v43  ;;  %762 = vmatmul.mubr.f32.gmra.mxu1 %v2566_v43 }
  0xc2   :  { %672 = vmatprep.mubr.f32.mxu0 %v2575_v50  ;;  %767 = vmatprep.mubr.f32.mxu1 %v2575_v50 }
  0xc5   :  { %673 = vmatmul.mubr.f32.gmra.mxu0 %v2580_v53  ;;  %768 = vmatmul.mubr.f32.gmra.mxu1 %v2580_v53 }
  0xc6   :  { %678 = vmatprep.mubr.f32.mxu0 %v101_v60  ;;  %773 = vmatprep.mubr.f32.mxu1 %v101_v60 }
  0xc9   :  { %679 = vmatmul.mubr.f32.gmra.mxu0 %v100_v0  ;;  %774 = vmatmul.mubr.f32.gmra.mxu1 %v100_v0  ;;  %v386_v0 = vsub.s32 6, %v2620_v63 }
  0xcb   :  { %v387_v9 = vrot.slane %v2629_v19, %v386_v0 }
 0x12f   :  { %v466_v26 = vpop.f32.mrf.mxu0  ;;  %v561_v27 = vpop.f32.mrf.mxu1 }
 0x130   :  { %v467_v28 = vadd.f32 %v466_v26, %v363_v22  ;;  %v562_v29 = vadd.f32 %v561_v27, %v371_v23 }
 0x131   :  { %v468_v30 = vpop.f32.mrf.mxu0  ;;  %v563_v31 = vpop.f32.mrf.mxu1 }
 0x132   :  { %780 = vst [vmem:[#allocation2] sm:$0xff] %v467_v28  ;;  %782 = vst [vmem:[#allocation2 + $0x10] sm:$0xff] %v562_v29  ;;  %v469_v32 = vadd.f32 %v468_v30, %v367_v24  ;;  %v564_v33 = vadd.f32 %v563_v31, %v375_v25 }
 0x134   :  { %781 = vst [vmem:[#allocation2 + $0x8] sm:$0xff] %v469_v32  ;;  %783 = vst [vmem:[#allocation2 + $0x18] sm:$0xff] %v564_v33 }
 0x15f   :  { %v472_v34 = vpop.f32.mrf.mxu0  ;;  %v567_v35 = vpop.f32.mrf.mxu1 }
 0x160   :  { %v473_v36 = vadd.f32 %v472_v34, %v363_v22  ;;  %v568_v37 = vadd.f32 %v567_v35, %v371_v23 }
 0x161   :  { %v474_v38 = vpop.f32.mrf.mxu0  ;;  %v569_v39 = vpop.f32.mrf.mxu1 }
 0x162   :  { %788 = vst [vmem:[#allocation2 + $0x40] sm:$0xff] %v473_v36  ;;  %790 = vst [vmem:[#allocation2 + $0x50] sm:$0xff] %v568_v37  ;;  %v475_v40 = vadd.f32 %v474_v38, %v367_v24  ;;  %v570_v41 = vadd.f32 %v569_v39, %v375_v25 }
 0x164   :  { %789 = vst [vmem:[#allocation2 + $0x48] sm:$0xff] %v475_v40  ;;  %791 = vst [vmem:[#allocation2 + $0x58] sm:$0xff] %v570_v41 }
 0x165   :  { %v478_v42 = vpop.f32.mrf.mxu0  ;;  %v573_v43 = vpop.f32.mrf.mxu1 }
 0x166   :  { %v479_v44 = vadd.f32 %v478_v42, %v363_v22  ;;  %v574_v45 = vadd.f32 %v573_v43, %v371_v23 }
 0x167   :  { %v480_v46 = vpop.f32.mrf.mxu0  ;;  %v575_v47 = vpop.f32.mrf.mxu1 }
 0x168   :  { %796 = vst [vmem:[#allocation2 + $0x80] sm:$0xff] %v479_v44  ;;  %798 = vst [vmem:[#allocation2 + $0x90] sm:$0xff] %v574_v45  ;;  %v481_v48 = vadd.f32 %v480_v46, %v367_v24  ;;  %v576_v49 = vadd.f32 %v575_v47, %v375_v25 }
 0x16a   :  { %797 = vst [vmem:[#allocation2 + $0x88] sm:$0xff] %v481_v48  ;;  %799 = vst [vmem:[#allocation2 + $0x98] sm:$0xff] %v576_v49 }
 0x16b   :  { %v484_v50 = vpop.f32.mrf.mxu0  ;;  %v579_v51 = vpop.f32.mrf.mxu1 }
 0x16c   :  { %v485_v52 = vadd.f32 %v484_v50, %v363_v22  ;;  %v580_v53 = vadd.f32 %v579_v51, %v371_v23 }
 0x16d   :  { %v486_v54 = vpop.f32.mrf.mxu0  ;;  %v581_v55 = vpop.f32.mrf.mxu1 }
 0x16e   :  { %804 = vst [vmem:[#allocation2 + $0xc0] sm:$0xff] %v485_v52  ;;  %806 = vst [vmem:[#allocation2 + $0xd0] sm:$0xff] %v580_v53  ;;  %v487_v56 = vadd.f32 %v486_v54, %v367_v24  ;;  %v582_v57 = vadd.f32 %v581_v55, %v375_v25 }
 0x170   :  { %805 = vst [vmem:[#allocation2 + $0xc8] sm:$0xff] %v487_v56  ;;  %807 = vst [vmem:[#allocation2 + $0xd8] sm:$0xff] %v582_v57 }
 0x171   :  { %v490_v58 = vpop.f32.mrf.mxu0  ;;  %v585_v59 = vpop.f32.mrf.mxu1 }
 0x172   :  { %v491_v60 = vadd.f32 %v490_v58, %v363_v22  ;;  %v586_v61 = vadd.f32 %v585_v59, %v371_v23 }
 0x173   :  { %v492_v2 = vpop.f32.mrf.mxu0  ;;  %v587_v3 = vpop.f32.mrf.mxu1 }
 0x174   :  { %812 = vst [vmem:[#allocation2 + $0x100] sm:$0xff] %v491_v60  ;;  %814 = vst [vmem:[#allocation2 + $0x110] sm:$0xff] %v586_v61  ;;  %v493_v4 = vadd.f32 %v492_v2, %v367_v24  ;;  %v588_v5 = vadd.f32 %v587_v3, %v375_v25 }
 0x176   :  { %813 = vst [vmem:[#allocation2 + $0x108] sm:$0xff] %v493_v4  ;;  %815 = vst [vmem:[#allocation2 + $0x118] sm:$0xff] %v588_v5 }
 0x179   :  { %v656_v14 = vpop.f32.mrf.mxu0  ;;  %v751_v15 = vpop.f32.mrf.mxu1 }
 0x17a   :  { %v657_v16 = vadd.f32 %v656_v14, %v379_v8  ;;  %v752_v17 = vadd.f32 %v751_v15, %v387_v9 }
 0x17b   :  { %v658_v18 = vpop.f32.mrf.mxu0  ;;  %v753_v21 = vpop.f32.mrf.mxu1 }
 0x17c   :  { %784 = vst [vmem:[#allocation2 + $0x20] sm:$0xff] %v657_v16  ;;  %786 = vst [vmem:[#allocation2 + $0x30] sm:$0xff] %v752_v17  ;;  %v659_v22 = vadd.f32 %v658_v18, %v383_v10  ;;  %v754_v23 = vadd.f32 %v753_v21, %v391_v13 }
 0x17d   :  { %v662_v24 = vpop.f32.mrf.mxu0  ;;  %v757_v25 = vpop.f32.mrf.mxu1 }
 0x17e   :  { %785 = vst [vmem:[#allocation2 + $0x28] sm:$0xff] %v659_v22  ;;  %787 = vst [vmem:[#allocation2 + $0x38] sm:$0xff] %v754_v23  ;;  %v663_v26 = vadd.f32 %v662_v24, %v379_v8  ;;  %v758_v27 = vadd.f32 %v757_v25, %v387_v9 }
 0x17f   :  { %v664_v28 = vpop.f32.mrf.mxu0  ;;  %v759_v29 = vpop.f32.mrf.mxu1 }
 0x180   :  { %792 = vst [vmem:[#allocation2 + $0x60] sm:$0xff] %v663_v26  ;;  %794 = vst [vmem:[#allocation2 + $0x70] sm:$0xff] %v758_v27  ;;  %v665_v19 = vadd.f32 %v664_v28, %v383_v10  ;;  %v760_v30 = vadd.f32 %v759_v29, %v391_v13 }
 0x181   :  { %v668_v31 = vpop.f32.mrf.mxu0  ;;  %v763_v32 = vpop.f32.mrf.mxu1 }
 0x182   :  { %793 = vst [vmem:[#allocation2 + $0x68] sm:$0xff] %v665_v19  ;;  %795 = vst [vmem:[#allocation2 + $0x78] sm:$0xff] %v760_v30  ;;  %v669_v33 = vadd.f32 %v668_v31, %v379_v8  ;;  %v764_v34 = vadd.f32 %v763_v32, %v387_v9 }
 0x183   :  { %v670_v35 = vpop.f32.mrf.mxu0  ;;  %v765_v36 = vpop.f32.mrf.mxu1 }
 0x184   :  { %800 = vst [vmem:[#allocation2 + $0xa0] sm:$0xff] %v669_v33  ;;  %802 = vst [vmem:[#allocation2 + $0xb0] sm:$0xff] %v764_v34  ;;  %v671_v37 = vadd.f32 %v670_v35, %v383_v10  ;;  %v766_v38 = vadd.f32 %v765_v36, %v391_v13 }
 0x185   :  { %v674_v39 = vpop.f32.mrf.mxu0  ;;  %v769_v40 = vpop.f32.mrf.mxu1 }
 0x186   :  { %801 = vst [vmem:[#allocation2 + $0xa8] sm:$0xff] %v671_v37  ;;  %803 = vst [vmem:[#allocation2 + $0xb8] sm:$0xff] %v766_v38  ;;  %v675_v41 = vadd.f32 %v674_v39, %v379_v8  ;;  %v770_v42 = vadd.f32 %v769_v40, %v387_v9 }
 0x187   :  { %v676_v43 = vpop.f32.mrf.mxu0  ;;  %v771_v44 = vpop.f32.mrf.mxu1 }
 0x188   :  { %808 = vst [vmem:[#allocation2 + $0xe0] sm:$0xff] %v675_v41  ;;  %810 = vst [vmem:[#allocation2 + $0xf0] sm:$0xff] %v770_v42  ;;  %v677_v45 = vadd.f32 %v676_v43, %v383_v10  ;;  %v772_v46 = vadd.f32 %v771_v44, %v391_v13 }
 0x189   :  { %v680_v47 = vpop.f32.mrf.mxu0  ;;  %v775_v48 = vpop.f32.mrf.mxu1 }
 0x18a   :  { %809 = vst [vmem:[#allocation2 + $0xe8] sm:$0xff] %v677_v45  ;;  %811 = vst [vmem:[#allocation2 + $0xf8] sm:$0xff] %v772_v46  ;;  %v681_v49 = vadd.f32 %v680_v47, %v379_v8  ;;  %v776_v50 = vadd.f32 %v775_v48, %v387_v9 }
 0x18b   :  { %v682_v51 = vpop.f32.mrf.mxu0  ;;  %v777_v52 = vpop.f32.mrf.mxu1 }
 0x18c   :  { %816 = vst [vmem:[#allocation2 + $0x120] sm:$0xff] %v681_v49  ;;  %818 = vst [vmem:[#allocation2 + $0x130] sm:$0xff] %v776_v50  ;;  %v683_v53 = vadd.f32 %v682_v51, %v383_v10  ;;  %v778_v54 = vadd.f32 %v777_v52, %v391_v13 }
 0x18e   :  { %817 = vst [vmem:[#allocation2 + $0x128] sm:$0xff] %v683_v53  ;;  %819 = vst [vmem:[#allocation2 + $0x138] sm:$0xff] %v778_v54 }
 0x18f LB: > { %v987_v55 = vld [vmem:[#allocation14 + $0x3c8] sm:$0xff]  ;;  %v989_v56 = vld [vmem:[#allocation14 + $0x3d8] sm:$0xff]  ;;  %v986_v57 = vld [vmem:[#allocation14 + $0x3c0] sm:$0xff]  ;;  %s855_s22 = sshra.s32 %s2422_s5, 3  ;;  %s858_s23 = sand.u32 7, %s2422_s5  ;;  %vm2433_vm4 = vmmov 0   ;;  %s2422_s5 = sphi %s2649_s5, %s1961_s5  }
 0x190   : > { %1133 = vmatprep.subr.mxu0 %v987_v55  ;;  %1204 = vmatprep.subr.mxu1 %v989_v56  ;;  %v988_v58 = vld [vmem:[#allocation14 + $0x3d0] sm:$0xff]  ;;  %v979_v59 = vld [vmem:[#allocation14 + $0x388] sm:$0xff]  ;;  %v981_v60 = vld [vmem:[#allocation14 + $0x398] sm:$0xff]  ;;  %s2079_s24 = sshll.u32 %s855_s22, 6  ;;  %s2080_s30 = sshll.u32 %s855_s22, 4  ;;  %vm1918_vm5 = vcmask 1040384  }
 0x191   : > { %1134 = vmatpush1.msra.mxu0 %v986_v57  ;;  %1205 = vmatpush1.msra.mxu1 %v988_v58  ;;  %v978_v61 = vld [vmem:[#allocation14 + $0x380] sm:$0xff]  ;;  %v980_v62 = vld [vmem:[#allocation14 + $0x390] sm:$0xff]  ;;  %v971_v0 = vld [vmem:[#allocation14 + $0x348] sm:$0xff]  ;;  %s2674_s25 = sadd.s32 %s2079_s24, %s858_s23  ;;  %s2851_s4 = sadd.s32 %s2080_s30, %s858_s23  ;;  %vm1938_vm6 = vcmask 0  }
 0x192   : > { %1135 = vmatprep.subr.mxu0 %v979_v59  ;;  %1206 = vmatprep.subr.mxu1 %v981_v60  ;;  %v973_v2 = vld [vmem:[#allocation14 + $0x358] sm:$0xff]  ;;  %v970_v3 = vld [vmem:[#allocation14 + $0x340] sm:$0xff]  ;;  %v972_v4 = vld [vmem:[#allocation14 + $0x350] sm:$0xff]  ;;  %s1510_s26 = scalar_lea.vmem %s3103_s2, %s2851_s4  ;;  %s2923_s1 = sld [smem:[#allocation6]] }
 0x193   : > { %1136 = vmatpush1.msra.mxu0 %v978_v61  ;;  %1207 = vmatpush1.msra.mxu1 %v980_v62  ;;  %v963_v5 = vld [vmem:[#allocation14 + $0x308] sm:$0xff]  ;;  %v965_v6 = vld [vmem:[#allocation14 + $0x318] sm:$0xff]  ;;  %v962_v7 = vld [vmem:[#allocation14 + $0x300] sm:$0xff]  ;;  %p846_p3 = scmp.lt.s32.totalorder %s2422_s5, 30  ;;  %s1951_s18 = scalar_lea.vmem [#allocation16], %s2851_s4 }
 0x194   : > { %1137 = vmatprep.subr.mxu0 %v971_v0  ;;  %1208 = vmatprep.subr.mxu1 %v973_v2  ;;  %v964_v8 = vld [vmem:[#allocation14 + $0x310] sm:$0xff]  ;;  %v955_v9 = vld [vmem:[#allocation14 + $0x2c8] sm:$0xff]  ;;  %v957_v10 = vld [vmem:[#allocation14 + $0x2d8] sm:$0xff]  ;;  %s1933_s20 = sld [smem:[#allocation8 + %s2422_s5]]  ;;  %p1958_p9 = scmp.eq.s32.totalorder %s2422_s5, 29 }
 0x195   : > { %1138 = vmatpush1.msra.mxu0 %v970_v3  ;;  %1209 = vmatpush1.msra.mxu1 %v972_v4  ;;  %v954_v13 = vld [vmem:[#allocation14 + $0x2c0] sm:$0xff]  ;;  %v956_v14 = vld [vmem:[#allocation14 + $0x2d0] sm:$0xff]  ;;  %v947_v15 = vld [vmem:[#allocation14 + $0x288] sm:$0xff]  ;;  %s849_s30 = scalar_select %p846_p3, 1, 0 }
 0x196   : > { %1139 = vmatprep.subr.mxu0 %v963_v5  ;;  %1210 = vmatprep.subr.mxu1 %v965_v6  ;;  %v949_v16 = vld [vmem:[#allocation14 + $0x298] sm:$0xff]  ;;  %v946_v17 = vld [vmem:[#allocation14 + $0x280] sm:$0xff]  ;;  %v948_v18 = vld [vmem:[#allocation14 + $0x290] sm:$0xff] }
 0x197   : > { %1140 = vmatpush1.msra.mxu0 %v962_v7  ;;  %1211 = vmatpush1.msra.mxu1 %v964_v8  ;;  %v939_v21 = vld [vmem:[#allocation14 + $0x248] sm:$0xff]  ;;  %v941_v22 = vld [vmem:[#allocation14 + $0x258] sm:$0xff]  ;;  %v938_v23 = vld [vmem:[#allocation14 + $0x240] sm:$0xff] }
 0x198   : > { %1141 = vmatprep.subr.mxu0 %v955_v9  ;;  %1212 = vmatprep.subr.mxu1 %v957_v10  ;;  %v940_v24 = vld [vmem:[#allocation14 + $0x250] sm:$0xff]  ;;  %v931_v25 = vld [vmem:[#allocation14 + $0x208] sm:$0xff]  ;;  %v933_v26 = vld [vmem:[#allocation14 + $0x218] sm:$0xff]  ;;  %s841_s28 = ssub.s32 %s3101_s0, %s2923_s1  ;;  %p840_p5 = scmp.lt.s32.totalorder %s2923_s1, 0 }
 0x199   : > { %1142 = vmatpush1.msra.mxu0 %v954_v13  ;;  %1213 = vmatpush1.msra.mxu1 %v956_v14  ;;  %v930_v27 = vld [vmem:[#allocation14 + $0x200] sm:$0xff]  ;;  %v932_v28 = vld [vmem:[#allocation14 + $0x210] sm:$0xff]  ;;  %v923_v29 = vld [vmem:[#allocation14 + $0x1c8] sm:$0xff]  ;;  %p842_p1 = scmp.lt.s32.totalorder %s841_s28, 10  ;;  %p2055_p2 = scmp.gt.s32.totalorder %s841_s28, 0 }
 0x19a   : > { %1143 = vmatprep.subr.mxu0 %v947_v15  ;;  %1214 = vmatprep.subr.mxu1 %v949_v16  ;;  %v925_v19 = vld [vmem:[#allocation14 + $0x1d8] sm:$0xff]  ;;  %v922_v30 = vld [vmem:[#allocation14 + $0x1c0] sm:$0xff]  ;;  %v924_v31 = vld [vmem:[#allocation14 + $0x1d0] sm:$0xff] }
 0x19b   : > { %1144 = vmatpush1.msra.mxu0 %v946_v17  ;;  %1215 = vmatpush1.msra.mxu1 %v948_v18  ;;  %v915_v32 = vld [vmem:[#allocation14 + $0x188] sm:$0xff]  ;;  %v917_v33 = vld [vmem:[#allocation14 + $0x198] sm:$0xff]  ;;  %v914_v34 = vld [vmem:[#allocation14 + $0x180] sm:$0xff]  ;;  %s3123_s28 = smov (!%p842_p1, %s841_s28), 10 }
 0x19c   : > { %1145 = vmatprep.subr.mxu0 %v939_v21  ;;  %1216 = vmatprep.subr.mxu1 %v941_v22  ;;  %v916_v35 = vld [vmem:[#allocation14 + $0x190] sm:$0xff]  ;;  %v907_v36 = vld [vmem:[#allocation14 + $0x148] sm:$0xff]  ;;  %v909_v37 = vld [vmem:[#allocation14 + $0x158] sm:$0xff]  ;;  %s3125_s28 = smov (!%p2055_p2, %s3123_s28), 0 }
 0x19d   : > { %1146 = vmatpush1.msra.mxu0 %v938_v23  ;;  %1217 = vmatpush1.msra.mxu1 %v940_v24  ;;  %v906_v38 = vld [vmem:[#allocation14 + $0x140] sm:$0xff]  ;;  %v908_v39 = vld [vmem:[#allocation14 + $0x150] sm:$0xff]  ;;  %v899_v40 = vld [vmem:[#allocation14 + $0x108] sm:$0xff] }
 0x19e   : > { %1147 = vmatprep.subr.mxu0 %v931_v25  ;;  %1218 = vmatprep.subr.mxu1 %v933_v26  ;;  %v901_v41 = vld [vmem:[#allocation14 + $0x118] sm:$0xff]  ;;  %v898_v42 = vld [vmem:[#allocation14 + $0x100] sm:$0xff]  ;;  %v900_v43 = vld [vmem:[#allocation14 + $0x110] sm:$0xff] }
 0x19f   : > { %1148 = vmatpush1.msra.mxu0 %v930_v27  ;;  %1219 = vmatpush1.msra.mxu1 %v932_v28  ;;  %v891_v44 = vld [vmem:[#allocation14 + $0xc8] sm:$0xff]  ;;  %v893_v45 = vld [vmem:[#allocation14 + $0xd8] sm:$0xff]  ;;  %v890_v46 = vld [vmem:[#allocation14 + $0xc0] sm:$0xff] }
 0x1a0   : > { %1149 = vmatprep.subr.mxu0 %v923_v29  ;;  %1220 = vmatprep.subr.mxu1 %v925_v19  ;;  %v892_v47 = vld [vmem:[#allocation14 + $0xd0] sm:$0xff]  ;;  %v883_v48 = vld [vmem:[#allocation14 + $0x88] sm:$0xff]  ;;  %v885_v49 = vld [vmem:[#allocation14 + $0x98] sm:$0xff] }
 0x1a1   : > { %1150 = vmatpush1.msra.mxu0 %v922_v30  ;;  %1221 = vmatpush1.msra.mxu1 %v924_v31  ;;  %v882_v50 = vld [vmem:[#allocation14 + $0x80] sm:$0xff]  ;;  %v884_v51 = vld [vmem:[#allocation14 + $0x90] sm:$0xff]  ;;  %v875_v52 = vld [vmem:[#allocation14 + $0x48] sm:$0xff] }
 0x1a2   : > { %1151 = vmatprep.subr.mxu0 %v915_v32  ;;  %1222 = vmatprep.subr.mxu1 %v917_v33  ;;  %v877_v53 = vld [vmem:[#allocation14 + $0x58] sm:$0xff]  ;;  %v874_v54 = vld [vmem:[#allocation14 + $0x40] sm:$0xff]  ;;  %v876_v55 = vld [vmem:[#allocation14 + $0x50] sm:$0xff] }
 0x1a3   : > { %1152 = vmatpush1.msra.mxu0 %v914_v34  ;;  %1223 = vmatpush1.msra.mxu1 %v916_v35  ;;  %v867_v56 = vld [vmem:[#allocation14 + $0x8] sm:$0xff]  ;;  %v869_v57 = vld [vmem:[#allocation14 + $0x18] sm:$0xff]  ;;  %v866_v58 = vld [vmem:[#allocation14] sm:$0xff] }
 0x1a4   : > { %1153 = vmatprep.subr.mxu0 %v907_v36  ;;  %1224 = vmatprep.subr.mxu1 %v909_v37  ;;  %v868_v59 = vld [vmem:[#allocation14 + $0x10] sm:$0xff]  ;;  %v1115_v60 = vld [vmem:[#allocation14 + $0x7c8] sm:$0xff]  ;;  %v1117_v61 = vld [vmem:[#allocation14 + $0x7d8] sm:$0xff] }
 0x1a5   : > { %1154 = vmatpush1.msra.mxu0 %v906_v38  ;;  %1225 = vmatpush1.msra.mxu1 %v908_v39  ;;  %v1114_v62 = vld [vmem:[#allocation14 + $0x7c0] sm:$0xff]  ;;  %v1116_v0 = vld [vmem:[#allocation14 + $0x7d0] sm:$0xff]  ;;  %v1107_v2 = vld [vmem:[#allocation14 + $0x788] sm:$0xff] }
 0x1a6   : > { %1155 = vmatprep.subr.mxu0 %v899_v40  ;;  %1226 = vmatprep.subr.mxu1 %v901_v41  ;;  %v1109_v3 = vld [vmem:[#allocation14 + $0x798] sm:$0xff]  ;;  %v1106_v4 = vld [vmem:[#allocation14 + $0x780] sm:$0xff]  ;;  %v1108_v5 = vld [vmem:[#allocation14 + $0x790] sm:$0xff] }
 0x1a7   : > { %1156 = vmatpush1.msra.mxu0 %v898_v42  ;;  %1227 = vmatpush1.msra.mxu1 %v900_v43  ;;  %v1099_v6 = vld [vmem:[#allocation14 + $0x748] sm:$0xff]  ;;  %v1101_v7 = vld [vmem:[#allocation14 + $0x758] sm:$0xff]  ;;  %v1098_v8 = vld [vmem:[#allocation14 + $0x740] sm:$0xff] }
 0x1a8   : > { %1157 = vmatprep.subr.mxu0 %v891_v44  ;;  %1228 = vmatprep.subr.mxu1 %v893_v45  ;;  %v1100_v9 = vld [vmem:[#allocation14 + $0x750] sm:$0xff]  ;;  %v1091_v10 = vld [vmem:[#allocation14 + $0x708] sm:$0xff]  ;;  %v1093_v13 = vld [vmem:[#allocation14 + $0x718] sm:$0xff] }
 0x1a9   : > { %1158 = vmatpush1.msra.mxu0 %v890_v46  ;;  %1229 = vmatpush1.msra.mxu1 %v892_v47  ;;  %v1090_v14 = vld [vmem:[#allocation14 + $0x700] sm:$0xff]  ;;  %v1092_v15 = vld [vmem:[#allocation14 + $0x710] sm:$0xff]  ;;  %v1083_v16 = vld [vmem:[#allocation14 + $0x6c8] sm:$0xff] }
 0x1aa   : > { %1159 = vmatprep.subr.mxu0 %v883_v48  ;;  %1230 = vmatprep.subr.mxu1 %v885_v49  ;;  %v1085_v17 = vld [vmem:[#allocation14 + $0x6d8] sm:$0xff]  ;;  %v1082_v18 = vld [vmem:[#allocation14 + $0x6c0] sm:$0xff]  ;;  %v1084_v21 = vld [vmem:[#allocation14 + $0x6d0] sm:$0xff] }
 0x1ab   : > { %1160 = vmatpush1.msra.mxu0 %v882_v50  ;;  %1231 = vmatpush1.msra.mxu1 %v884_v51  ;;  %v1075_v22 = vld [vmem:[#allocation14 + $0x688] sm:$0xff]  ;;  %v1077_v23 = vld [vmem:[#allocation14 + $0x698] sm:$0xff]  ;;  %v1074_v24 = vld [vmem:[#allocation14 + $0x680] sm:$0xff] }
 0x1ac   : > { %1161 = vmatprep.subr.mxu0 %v875_v52  ;;  %1232 = vmatprep.subr.mxu1 %v877_v53  ;;  %v1076_v25 = vld [vmem:[#allocation14 + $0x690] sm:$0xff]  ;;  %v1067_v26 = vld [vmem:[#allocation14 + $0x648] sm:$0xff]  ;;  %v1069_v27 = vld [vmem:[#allocation14 + $0x658] sm:$0xff] }
 0x1ad   : > { %1162 = vmatpush1.msra.mxu0 %v874_v54  ;;  %1233 = vmatpush1.msra.mxu1 %v876_v55  ;;  %v1066_v28 = vld [vmem:[#allocation14 + $0x640] sm:$0xff]  ;;  %v1068_v29 = vld [vmem:[#allocation14 + $0x650] sm:$0xff]  ;;  %v1059_v19 = vld [vmem:[#allocation14 + $0x608] sm:$0xff] }
 0x1ae   : > { %1163 = vmatprep.subr.mxu0 %v867_v56  ;;  %1234 = vmatprep.subr.mxu1 %v869_v57  ;;  %v1061_v30 = vld [vmem:[#allocation14 + $0x618] sm:$0xff]  ;;  %v1058_v31 = vld [vmem:[#allocation14 + $0x600] sm:$0xff]  ;;  %v1060_v32 = vld [vmem:[#allocation14 + $0x610] sm:$0xff] }
 0x1af   : > { %1164 = vmatpush1.msra.mxu0 %v866_v58  ;;  %1235 = vmatpush1.msra.mxu1 %v868_v59  ;;  %v1051_v33 = vld [vmem:[#allocation14 + $0x5c8] sm:$0xff]  ;;  %v1053_v34 = vld [vmem:[#allocation14 + $0x5d8] sm:$0xff]  ;;  %v1050_v35 = vld [vmem:[#allocation14 + $0x5c0] sm:$0xff] }
 0x1b0   : > { %1165 = vmatprep.subr.mxu0 %v1115_v60  ;;  %1236 = vmatprep.subr.mxu1 %v1117_v61  ;;  %v1052_v36 = vld [vmem:[#allocation14 + $0x5d0] sm:$0xff]  ;;  %v1043_v37 = vld [vmem:[#allocation14 + $0x588] sm:$0xff]  ;;  %v1045_v38 = vld [vmem:[#allocation14 + $0x598] sm:$0xff] }
 0x1b1   : > { %1166 = vmatpush2.msra.mxu0 %v1114_v62  ;;  %1237 = vmatpush2.msra.mxu1 %v1116_v0  ;;  %v1042_v39 = vld [vmem:[#allocation14 + $0x580] sm:$0xff]  ;;  %v1044_v40 = vld [vmem:[#allocation14 + $0x590] sm:$0xff]  ;;  %v1035_v41 = vld [vmem:[#allocation14 + $0x548] sm:$0xff] }
 0x1b2   : > { %1167 = vmatprep.subr.mxu0 %v1107_v2  ;;  %1238 = vmatprep.subr.mxu1 %v1109_v3  ;;  %v1037_v42 = vld [vmem:[#allocation14 + $0x558] sm:$0xff]  ;;  %v1034_v43 = vld [vmem:[#allocation14 + $0x540] sm:$0xff]  ;;  %v1036_v44 = vld [vmem:[#allocation14 + $0x550] sm:$0xff] }
 0x1b3   : > { %1168 = vmatpush2.msra.mxu0 %v1106_v4  ;;  %1239 = vmatpush2.msra.mxu1 %v1108_v5  ;;  %v1027_v45 = vld [vmem:[#allocation14 + $0x508] sm:$0xff]  ;;  %v1029_v46 = vld [vmem:[#allocation14 + $0x518] sm:$0xff]  ;;  %v1026_v47 = vld [vmem:[#allocation14 + $0x500] sm:$0xff] }
 0x1b4   : > { %1169 = vmatprep.subr.mxu0 %v1099_v6  ;;  %1240 = vmatprep.subr.mxu1 %v1101_v7  ;;  %v1028_v48 = vld [vmem:[#allocation14 + $0x510] sm:$0xff]  ;;  %v1019_v49 = vld [vmem:[#allocation14 + $0x4c8] sm:$0xff]  ;;  %v1021_v50 = vld [vmem:[#allocation14 + $0x4d8] sm:$0xff] }
 0x1b5   : > { %1170 = vmatpush2.msra.mxu0 %v1098_v8  ;;  %1241 = vmatpush2.msra.mxu1 %v1100_v9  ;;  %v1018_v51 = vld [vmem:[#allocation14 + $0x4c0] sm:$0xff]  ;;  %v1020_v52 = vld [vmem:[#allocation14 + $0x4d0] sm:$0xff]  ;;  %v1011_v53 = vld [vmem:[#allocation14 + $0x488] sm:$0xff] }
 0x1b6   : > { %1171 = vmatprep.subr.mxu0 %v1091_v10  ;;  %1242 = vmatprep.subr.mxu1 %v1093_v13  ;;  %v1013_v54 = vld [vmem:[#allocation14 + $0x498] sm:$0xff]  ;;  %v1010_v55 = vld [vmem:[#allocation14 + $0x480] sm:$0xff]  ;;  %v1012_v56 = vld [vmem:[#allocation14 + $0x490] sm:$0xff] }
 0x1b7   : > { %1172 = vmatpush2.msra.mxu0 %v1090_v14  ;;  %1243 = vmatpush2.msra.mxu1 %v1092_v15  ;;  %v853_v57 = vld [vmem:[#allocation3] sm:$0x3]  ;;  %v1003_v58 = vld [vmem:[#allocation14 + $0x448] sm:$0xff]  ;;  %v1002_v60 = vld [vmem:[#allocation14 + $0x440] sm:$0xff] }
 0x1b8   : > { %1173 = vmatprep.subr.mxu0 %v1083_v16  ;;  %1244 = vmatprep.subr.mxu1 %v1085_v17  ;;  %v1005_v59 = vld [vmem:[#allocation14 + $0x458] sm:$0xff]  ;;  %v1004_v61 = vld [vmem:[#allocation14 + $0x450] sm:$0xff]  ;;  %v995_v62 = vld [vmem:[#allocation14 + $0x408] sm:$0xff]  ;;  %v2655_v2 = vrot.slane %v853_v57, %v2632_v20  ;;  %v2658_v5 = vrot.slane %v853_v57, %v2623_v1 }
 0x1b9   : > { %1174 = vmatpush2.msra.mxu0 %v1082_v18  ;;  %1245 = vmatpush2.msra.mxu1 %v1084_v21  ;;  %v997_v0 = vld [vmem:[#allocation14 + $0x418] sm:$0xff]  ;;  %v994_v3 = vld [vmem:[#allocation14 + $0x400] sm:$0xff]  ;;  %v996_v4 = vld [vmem:[#allocation14 + $0x410] sm:$0xff] }
 0x1ba   : > { %1175 = vmatprep.subr.mxu0 %v1075_v22  ;;  %1246 = vmatprep.subr.mxu1 %v1077_v23  ;;  %v991_v6 = vld [vmem:[#allocation14 + $0x3e8] sm:$0xff]  ;;  %v993_v7 = vld [vmem:[#allocation14 + $0x3f8] sm:$0xff]  ;;  %v990_v8 = vld [vmem:[#allocation14 + $0x3e0] sm:$0xff] }
 0x1bb   : > { %1176 = vmatpush2.msra.mxu0 %v1074_v24  ;;  %1247 = vmatpush2.msra.mxu1 %v1076_v25  ;;  %v992_v9 = vld [vmem:[#allocation14 + $0x3f0] sm:$0xff]  ;;  %v983_v10 = vld [vmem:[#allocation14 + $0x3a8] sm:$0xff]  ;;  %v985_v13 = vld [vmem:[#allocation14 + $0x3b8] sm:$0xff] }
 0x1bc   : > { %1177 = vmatprep.subr.mxu0 %v1067_v26  ;;  %1248 = vmatprep.subr.mxu1 %v1069_v27  ;;  %v982_v14 = vld [vmem:[#allocation14 + $0x3a0] sm:$0xff]  ;;  %v984_v15 = vld [vmem:[#allocation14 + $0x3b0] sm:$0xff]  ;;  %v975_v16 = vld [vmem:[#allocation14 + $0x368] sm:$0xff] }
 0x1bd   : > { %1178 = vmatpush2.msra.mxu0 %v1066_v28  ;;  %1249 = vmatpush2.msra.mxu1 %v1068_v29  ;;  %v977_v17 = vld [vmem:[#allocation14 + $0x378] sm:$0xff]  ;;  %v974_v18 = vld [vmem:[#allocation14 + $0x360] sm:$0xff]  ;;  %v976_v21 = vld [vmem:[#allocation14 + $0x370] sm:$0xff] }
 0x1be   : > { %1179 = vmatprep.subr.mxu0 %v1059_v19  ;;  %1250 = vmatprep.subr.mxu1 %v1061_v30  ;;  %v967_v22 = vld [vmem:[#allocation14 + $0x328] sm:$0xff]  ;;  %v969_v23 = vld [vmem:[#allocation14 + $0x338] sm:$0xff]  ;;  %v966_v24 = vld [vmem:[#allocation14 + $0x320] sm:$0xff] }
 0x1bf   : > { %1180 = vmatpush2.msra.mxu0 %v1058_v31  ;;  %1251 = vmatpush2.msra.mxu1 %v1060_v32  ;;  %v968_v25 = vld [vmem:[#allocation14 + $0x330] sm:$0xff]  ;;  %v959_v26 = vld [vmem:[#allocation14 + $0x2e8] sm:$0xff]  ;;  %v961_v27 = vld [vmem:[#allocation14 + $0x2f8] sm:$0xff] }
 0x1c0   : > { %1181 = vmatprep.subr.mxu0 %v1051_v33  ;;  %1252 = vmatprep.subr.mxu1 %v1053_v34  ;;  %v958_v28 = vld [vmem:[#allocation14 + $0x2e0] sm:$0xff]  ;;  %v960_v29 = vld [vmem:[#allocation14 + $0x2f0] sm:$0xff]  ;;  %v951_v19 = vld [vmem:[#allocation14 + $0x2a8] sm:$0xff] }
 0x1c1   : > { %1182 = vmatpush2.msra.mxu0 %v1050_v35  ;;  %1253 = vmatpush2.msra.mxu1 %v1052_v36  ;;  %v953_v30 = vld [vmem:[#allocation14 + $0x2b8] sm:$0xff]  ;;  %v950_v31 = vld [vmem:[#allocation14 + $0x2a0] sm:$0xff]  ;;  %v952_v32 = vld [vmem:[#allocation14 + $0x2b0] sm:$0xff] }
 0x1c2   : > { %1183 = vmatprep.subr.mxu0 %v1043_v37  ;;  %1254 = vmatprep.subr.mxu1 %v1045_v38  ;;  %v943_v33 = vld [vmem:[#allocation14 + $0x268] sm:$0xff]  ;;  %v945_v34 = vld [vmem:[#allocation14 + $0x278] sm:$0xff]  ;;  %v942_v35 = vld [vmem:[#allocation14 + $0x260] sm:$0xff] }
 0x1c3   : > { %1184 = vmatpush2.msra.mxu0 %v1042_v39  ;;  %1255 = vmatpush2.msra.mxu1 %v1044_v40  ;;  %v944_v36 = vld [vmem:[#allocation14 + $0x270] sm:$0xff]  ;;  %v935_v37 = vld [vmem:[#allocation14 + $0x228] sm:$0xff]  ;;  %v937_v38 = vld [vmem:[#allocation14 + $0x238] sm:$0xff] }
 0x1c4   : > { %1185 = vmatprep.subr.mxu0 %v1035_v41  ;;  %1256 = vmatprep.subr.mxu1 %v1037_v42  ;;  %v934_v39 = vld [vmem:[#allocation14 + $0x220] sm:$0xff]  ;;  %v936_v40 = vld [vmem:[#allocation14 + $0x230] sm:$0xff]  ;;  %v927_v41 = vld [vmem:[#allocation14 + $0x1e8] sm:$0xff] }
 0x1c5   : > { %1186 = vmatpush2.msra.mxu0 %v1034_v43  ;;  %1257 = vmatpush2.msra.mxu1 %v1036_v44  ;;  %v929_v42 = vld [vmem:[#allocation14 + $0x1f8] sm:$0xff]  ;;  %v926_v43 = vld [vmem:[#allocation14 + $0x1e0] sm:$0xff]  ;;  %v928_v44 = vld [vmem:[#allocation14 + $0x1f0] sm:$0xff] }
 0x1c6   : > { %1187 = vmatprep.subr.mxu0 %v1027_v45  ;;  %1258 = vmatprep.subr.mxu1 %v1029_v46  ;;  %v919_v45 = vld [vmem:[#allocation14 + $0x1a8] sm:$0xff]  ;;  %v921_v46 = vld [vmem:[#allocation14 + $0x1b8] sm:$0xff] }
 0x1c7   : > { %1188 = vmatpush2.msra.mxu0 %v1026_v47  ;;  %1259 = vmatpush2.msra.mxu1 %v1028_v48  ;;  %v918_v47 = vld [vmem:[#allocation14 + $0x1a0] sm:$0xff]  ;;  %v920_v48 = vld [vmem:[#allocation14 + $0x1b0] sm:$0xff]  ;;  %v895_v57 = vld [vmem:[#allocation14 + $0xe8] sm:$0xff] }
 0x1c8   : > { %1189 = vmatprep.subr.mxu0 %v1019_v49  ;;  %1260 = vmatprep.subr.mxu1 %v1021_v50  ;;  %v911_v49 = vld [vmem:[#allocation14 + $0x168] sm:$0xff]  ;;  %v913_v50 = vld [vmem:[#allocation14 + $0x178] sm:$0xff] }
 0x1c9   : > { %1190 = vmatpush2.msra.mxu0 %v1018_v51  ;;  %1261 = vmatpush2.msra.mxu1 %v1020_v52  ;;  %v910_v51 = vld [vmem:[#allocation14 + $0x160] sm:$0xff]  ;;  %v912_v52 = vld [vmem:[#allocation14 + $0x170] sm:$0xff] }
 0x1ca   : > { %1191 = vmatprep.subr.mxu0 %v1011_v53  ;;  %1262 = vmatprep.subr.mxu1 %v1013_v54  ;;  %v903_v53 = vld [vmem:[#allocation14 + $0x128] sm:$0xff]  ;;  %v905_v54 = vld [vmem:[#allocation14 + $0x138] sm:$0xff] }
 0x1cb   : > { %1192 = vmatpush2.msra.mxu0 %v1010_v55  ;;  %1263 = vmatpush2.msra.mxu1 %v1012_v56  ;;  %v902_v55 = vld [vmem:[#allocation14 + $0x120] sm:$0xff]  ;;  %v904_v56 = vld [vmem:[#allocation14 + $0x130] sm:$0xff] }
 0x1cc   : > { %1193 = vmatprep.subr.mxu0 %v1003_v58  ;;  %1264 = vmatprep.subr.mxu1 %v1005_v59  ;;  %v897_v58 = vld [vmem:[#allocation14 + $0xf8] sm:$0xff]  ;;  %v894_v59 = vld [vmem:[#allocation14 + $0xe0] sm:$0xff] }
 0x1cd   : > { %1194 = vmatpush2.msra.mxu0 %v1002_v60  ;;  %1265 = vmatpush2.msra.mxu1 %v1004_v61  ;;  %v896_v60 = vld [vmem:[#allocation14 + $0xf0] sm:$0xff]  ;;  %v887_v61 = vld [vmem:[#allocation14 + $0xa8] sm:$0xff] }
 0x1ce   : > { %1195 = vmatprep.subr.mxu0 %v995_v62  ;;  %1266 = vmatprep.subr.mxu1 %v997_v0  ;;  %v889_v62 = vld [vmem:[#allocation14 + $0xb8] sm:$0xff]  ;;  %v886_v0 = vld [vmem:[#allocation14 + $0xa0] sm:$0xff] }
 0x1cf   : > { %1196 = vmatpush2.msra.mxu0 %v994_v3  ;;  %1197 = vmatprep.mubr.f32.mxu0 %v2655_v2  ;;  %v888_v3 = vld [vmem:[#allocation14 + $0xb0] sm:$0xff] }
 0x1d0   : > { %1267 = vmatpush2.msra.mxu1 %v996_v4  ;;  %1268 = vmatprep.mubr.f32.mxu1 %v2655_v2  ;;  %v879_v4 = vld [vmem:[#allocation14 + $0x68] sm:$0xff] }
 0x1d1   : > { %1198 = vmatmul.mubr.f32.vlgmr.msra.gmra.mxu0 %v2658_v5  ;;  %1269 = vmatmul.mubr.f32.vlgmr.msra.gmra.mxu1 %v2658_v5 }
 0x1d2   : > { %1275 = vmatprep.subr.mxu0 %v991_v6  ;;  %1346 = vmatprep.subr.mxu1 %v993_v7  ;;  %v881_v6 = vld [vmem:[#allocation14 + $0x78] sm:$0xff]  ;;  %v878_v7 = vld [vmem:[#allocation14 + $0x60] sm:$0xff] }
 0x1d3   : > { %1276 = vmatpush1.msra.mxu0 %v990_v8  ;;  %1347 = vmatpush1.msra.mxu1 %v992_v9  ;;  %v880_v8 = vld [vmem:[#allocation14 + $0x70] sm:$0xff]  ;;  %v871_v9 = vld [vmem:[#allocation14 + $0x28] sm:$0xff] }
 0x1d4   : > { %1277 = vmatprep.subr.mxu0 %v983_v10  ;;  %1348 = vmatprep.subr.mxu1 %v985_v13  ;;  %v873_v10 = vld [vmem:[#allocation14 + $0x38] sm:$0xff]  ;;  %v870_v13 = vld [vmem:[#allocation14 + $0x20] sm:$0xff] }
 0x1d5   : > { %1278 = vmatpush1.msra.mxu0 %v982_v14  ;;  %1349 = vmatpush1.msra.mxu1 %v984_v15  ;;  %v872_v14 = vld [vmem:[#allocation14 + $0x30] sm:$0xff]  ;;  %v1119_v15 = vld [vmem:[#allocation14 + $0x7e8] sm:$0xff] }
 0x1d6   : > { %1279 = vmatprep.subr.mxu0 %v975_v16  ;;  %1350 = vmatprep.subr.mxu1 %v977_v17  ;;  %v1121_v16 = vld [vmem:[#allocation14 + $0x7f8] sm:$0xff]  ;;  %v1118_v17 = vld [vmem:[#allocation14 + $0x7e0] sm:$0xff] }
 0x1d7   : > { %1280 = vmatpush1.msra.mxu0 %v974_v18  ;;  %1351 = vmatpush1.msra.mxu1 %v976_v21  ;;  %v1120_v18 = vld [vmem:[#allocation14 + $0x7f0] sm:$0xff]  ;;  %v1111_v21 = vld [vmem:[#allocation14 + $0x7a8] sm:$0xff] }
 0x1d8   : > { %1281 = vmatprep.subr.mxu0 %v967_v22  ;;  %1352 = vmatprep.subr.mxu1 %v969_v23  ;;  %v1113_v22 = vld [vmem:[#allocation14 + $0x7b8] sm:$0xff]  ;;  %v1110_v23 = vld [vmem:[#allocation14 + $0x7a0] sm:$0xff] }
 0x1d9   : > { %1282 = vmatpush1.msra.mxu0 %v966_v24  ;;  %1353 = vmatpush1.msra.mxu1 %v968_v25  ;;  %v1112_v24 = vld [vmem:[#allocation14 + $0x7b0] sm:$0xff]  ;;  %v1103_v25 = vld [vmem:[#allocation14 + $0x768] sm:$0xff] }
 0x1da   : > { %1283 = vmatprep.subr.mxu0 %v959_v26  ;;  %1354 = vmatprep.subr.mxu1 %v961_v27  ;;  %v1105_v26 = vld [vmem:[#allocation14 + $0x778] sm:$0xff]  ;;  %v1102_v27 = vld [vmem:[#allocation14 + $0x760] sm:$0xff] }
 0x1db   : > { %1284 = vmatpush1.msra.mxu0 %v958_v28  ;;  %1355 = vmatpush1.msra.mxu1 %v960_v29  ;;  %v1104_v28 = vld [vmem:[#allocation14 + $0x770] sm:$0xff]  ;;  %v1095_v29 = vld [vmem:[#allocation14 + $0x728] sm:$0xff] }
 0x1dc   : > { %1285 = vmatprep.subr.mxu0 %v951_v19  ;;  %1356 = vmatprep.subr.mxu1 %v953_v30  ;;  %v1097_v19 = vld [vmem:[#allocation14 + $0x738] sm:$0xff]  ;;  %v1094_v30 = vld [vmem:[#allocation14 + $0x720] sm:$0xff] }
 0x1dd   : > { %1286 = vmatpush1.msra.mxu0 %v950_v31  ;;  %1357 = vmatpush1.msra.mxu1 %v952_v32  ;;  %v1096_v31 = vld [vmem:[#allocation14 + $0x730] sm:$0xff]  ;;  %v1087_v32 = vld [vmem:[#allocation14 + $0x6e8] sm:$0xff] }
 0x1de   : > { %1287 = vmatprep.subr.mxu0 %v943_v33  ;;  %1358 = vmatprep.subr.mxu1 %v945_v34  ;;  %v1089_v33 = vld [vmem:[#allocation14 + $0x6f8] sm:$0xff]  ;;  %v1086_v34 = vld [vmem:[#allocation14 + $0x6e0] sm:$0xff] }
 0x1df   : > { %1288 = vmatpush1.msra.mxu0 %v942_v35  ;;  %1359 = vmatpush1.msra.mxu1 %v944_v36  ;;  %v1088_v35 = vld [vmem:[#allocation14 + $0x6f0] sm:$0xff]  ;;  %v1079_v36 = vld [vmem:[#allocation14 + $0x6a8] sm:$0xff] }
 0x1e0   : > { %1289 = vmatprep.subr.mxu0 %v935_v37  ;;  %1360 = vmatprep.subr.mxu1 %v937_v38  ;;  %v1081_v37 = vld [vmem:[#allocation14 + $0x6b8] sm:$0xff]  ;;  %v1078_v38 = vld [vmem:[#allocation14 + $0x6a0] sm:$0xff] }
 0x1e1   : > { %1290 = vmatpush1.msra.mxu0 %v934_v39  ;;  %1361 = vmatpush1.msra.mxu1 %v936_v40  ;;  %v1080_v39 = vld [vmem:[#allocation14 + $0x6b0] sm:$0xff]  ;;  %v1071_v40 = vld [vmem:[#allocation14 + $0x668] sm:$0xff] }
 0x1e2   : > { %1291 = vmatprep.subr.mxu0 %v927_v41  ;;  %1362 = vmatprep.subr.mxu1 %v929_v42  ;;  %v1073_v41 = vld [vmem:[#allocation14 + $0x678] sm:$0xff]  ;;  %v1070_v42 = vld [vmem:[#allocation14 + $0x660] sm:$0xff] }
 0x1e3   : > { %1292 = vmatpush1.msra.mxu0 %v926_v43  ;;  %1363 = vmatpush1.msra.mxu1 %v928_v44  ;;  %v1072_v43 = vld [vmem:[#allocation14 + $0x670] sm:$0xff]  ;;  %v1063_v44 = vld [vmem:[#allocation14 + $0x628] sm:$0xff] }
 0x1e4   : > { %1293 = vmatprep.subr.mxu0 %v919_v45  ;;  %1364 = vmatprep.subr.mxu1 %v921_v46  ;;  %v1065_v45 = vld [vmem:[#allocation14 + $0x638] sm:$0xff]  ;;  %v1062_v46 = vld [vmem:[#allocation14 + $0x620] sm:$0xff] }
 0x1e5   : > { %1294 = vmatpush1.msra.mxu0 %v918_v47  ;;  %1365 = vmatpush1.msra.mxu1 %v920_v48  ;;  %v1064_v47 = vld [vmem:[#allocation14 + $0x630] sm:$0xff]  ;;  %v1055_v48 = vld [vmem:[#allocation14 + $0x5e8] sm:$0xff] }
 0x1e6   : > { %1295 = vmatprep.subr.mxu0 %v911_v49  ;;  %1366 = vmatprep.subr.mxu1 %v913_v50  ;;  %v1057_v49 = vld [vmem:[#allocation14 + $0x5f8] sm:$0xff]  ;;  %v1054_v50 = vld [vmem:[#allocation14 + $0x5e0] sm:$0xff] }
 0x1e7   : > { %1296 = vmatpush1.msra.mxu0 %v910_v51  ;;  %1367 = vmatpush1.msra.mxu1 %v912_v52  ;;  %v1056_v51 = vld [vmem:[#allocation14 + $0x5f0] sm:$0xff]  ;;  %v1047_v52 = vld [vmem:[#allocation14 + $0x5a8] sm:$0xff] }
 0x1e8   : > { %1297 = vmatprep.subr.mxu0 %v903_v53  ;;  %1368 = vmatprep.subr.mxu1 %v905_v54  ;;  %v1049_v53 = vld [vmem:[#allocation14 + $0x5b8] sm:$0xff]  ;;  %v1046_v54 = vld [vmem:[#allocation14 + $0x5a0] sm:$0xff] }
 0x1e9   : > { %1298 = vmatpush1.msra.mxu0 %v902_v55  ;;  %1369 = vmatpush1.msra.mxu1 %v904_v56  ;;  %v1048_v55 = vld [vmem:[#allocation14 + $0x5b0] sm:$0xff]  ;;  %v1039_v56 = vld [vmem:[#allocation14 + $0x568] sm:$0xff] }
 0x1ea   : > { %1299 = vmatprep.subr.mxu0 %v895_v57  ;;  %1370 = vmatprep.subr.mxu1 %v897_v58  ;;  %v1041_v57 = vld [vmem:[#allocation14 + $0x578] sm:$0xff]  ;;  %v1038_v58 = vld [vmem:[#allocation14 + $0x560] sm:$0xff] }
 0x1eb   : > { %1300 = vmatpush1.msra.mxu0 %v894_v59  ;;  %1371 = vmatpush1.msra.mxu1 %v896_v60  ;;  %v1040_v59 = vld [vmem:[#allocation14 + $0x570] sm:$0xff]  ;;  %v1031_v60 = vld [vmem:[#allocation14 + $0x528] sm:$0xff] }
 0x1ec   : > { %1301 = vmatprep.subr.mxu0 %v887_v61  ;;  %1372 = vmatprep.subr.mxu1 %v889_v62  ;;  %v1033_v61 = vld [vmem:[#allocation14 + $0x538] sm:$0xff]  ;;  %v1030_v62 = vld [vmem:[#allocation14 + $0x520] sm:$0xff] }
 0x1ed   : > { %1302 = vmatpush1.msra.mxu0 %v886_v0  ;;  %1373 = vmatpush1.msra.mxu1 %v888_v3  ;;  %v1032_v0 = vld [vmem:[#allocation14 + $0x530] sm:$0xff]  ;;  %v1023_v3 = vld [vmem:[#allocation14 + $0x4e8] sm:$0xff] }
 0x1ee   : > { %1303 = vmatprep.subr.mxu0 %v879_v4  ;;  %1374 = vmatprep.subr.mxu1 %v881_v6  ;;  %v1025_v4 = vld [vmem:[#allocation14 + $0x4f8] sm:$0xff]  ;;  %v1022_v6 = vld [vmem:[#allocation14 + $0x4e0] sm:$0xff] }
 0x1ef   : > { %1304 = vmatpush1.msra.mxu0 %v878_v7  ;;  %1375 = vmatpush1.msra.mxu1 %v880_v8  ;;  %v1024_v7 = vld [vmem:[#allocation14 + $0x4f0] sm:$0xff]  ;;  %v1015_v8 = vld [vmem:[#allocation14 + $0x4a8] sm:$0xff] }
 0x1f0   : > { %1305 = vmatprep.subr.mxu0 %v871_v9  ;;  %1376 = vmatprep.subr.mxu1 %v873_v10  ;;  %v1017_v9 = vld [vmem:[#allocation14 + $0x4b8] sm:$0xff]  ;;  %v1014_v10 = vld [vmem:[#allocation14 + $0x4a0] sm:$0xff] }
 0x1f1   : > { %1306 = vmatpush1.msra.mxu0 %v870_v13  ;;  %1377 = vmatpush1.msra.mxu1 %v872_v14  ;;  %v1016_v13 = vld [vmem:[#allocation14 + $0x4b0] sm:$0xff]  ;;  %v1007_v14 = vld [vmem:[#allocation14 + $0x468] sm:$0xff] }
 0x1f2   : > { %1307 = vmatprep.subr.mxu0 %v1119_v15  ;;  %1378 = vmatprep.subr.mxu1 %v1121_v16  ;;  %v1009_v15 = vld [vmem:[#allocation14 + $0x478] sm:$0xff]  ;;  %v1006_v16 = vld [vmem:[#allocation14 + $0x460] sm:$0xff] }
 0x1f3   : > { %1308 = vmatpush2.msra.mxu0 %v1118_v17  ;;  %1379 = vmatpush2.msra.mxu1 %v1120_v18  ;;  %v1008_v17 = vld [vmem:[#allocation14 + $0x470] sm:$0xff]  ;;  %v999_v18 = vld [vmem:[#allocation14 + $0x428] sm:$0xff] }
 0x1f4   : > { %1309 = vmatprep.subr.mxu0 %v1111_v21  ;;  %1380 = vmatprep.subr.mxu1 %v1113_v22  ;;  %v1001_v21 = vld [vmem:[#allocation14 + $0x438] sm:$0xff]  ;;  %v998_v22 = vld [vmem:[#allocation14 + $0x420] sm:$0xff] }
 0x1f5   : > { %1310 = vmatpush2.msra.mxu0 %v1110_v23  ;;  %1381 = vmatpush2.msra.mxu1 %v1112_v24  ;;  %v1000_v23 = vld [vmem:[#allocation14 + $0x430] sm:$0xff] }
 0x1f6   : > { %1311 = vmatprep.subr.mxu0 %v1103_v25  ;;  %1382 = vmatprep.subr.mxu1 %v1105_v26  ;;  %v1575_v24 = vld [vmem:[%s3108_s7 + $0xf8] sm:$0xff]  ;;  %v1558_v26 = vld [vmem:[%s3108_s7 + $0x70] sm:$0xff] }
 0x1f7   : > { %1312 = vmatpush2.msra.mxu0 %v1102_v27  ;;  %1383 = vmatpush2.msra.mxu1 %v1104_v28  ;;  %v1559_v25 = vld [vmem:[%s3108_s7 + $0x78] sm:$0xff]  ;;  %v1573_v28 = vld [vmem:[%s3108_s7 + $0xe8] sm:$0xff] }
 0x1f8   : > { %1313 = vmatprep.subr.mxu0 %v1095_v29  ;;  %1384 = vmatprep.subr.mxu1 %v1097_v19  ;;  %v1527_v27 = vld [vmem:[%s3107_s6 + $0x78] sm:$0xff]  ;;  %v1542_v29 = vld [vmem:[%s3107_s6 + $0xf0] sm:$0xff]  ;;  %v1557_v19 = vld [vmem:[%s3108_s7 + $0x68] sm:$0xff] }
 0x1f9   : > { %1314 = vmatpush2.msra.mxu0 %v1094_v30  ;;  %1385 = vmatpush2.msra.mxu1 %v1096_v31  ;;  %v1526_v30 = vld [vmem:[%s3107_s6 + $0x70] sm:$0xff]  ;;  %v1541_v31 = vld [vmem:[%s3107_s6 + $0xe8] sm:$0xff] }
 0x1fa   : > { %1315 = vmatprep.subr.mxu0 %v1087_v32  ;;  %1386 = vmatprep.subr.mxu1 %v1089_v33  ;;  %v1572_v32 = vld [vmem:[%s3108_s7 + $0xe0] sm:$0xff]  ;;  %v1525_v33 = vld [vmem:[%s3107_s6 + $0x68] sm:$0xff] }
 0x1fb   : > { %1316 = vmatpush2.msra.mxu0 %v1086_v34  ;;  %1387 = vmatpush2.msra.mxu1 %v1088_v35  ;;  %v1556_v34 = vld [vmem:[%s3108_s7 + $0x60] sm:$0xff] }
 0x1fc   : > { %1317 = vmatprep.subr.mxu0 %v1079_v36  ;;  %1388 = vmatprep.subr.mxu1 %v1081_v37  ;;  %v1540_v35 = vld [vmem:[%s3107_s6 + $0xe0] sm:$0xff]  ;;  %v1571_v36 = vld [vmem:[%s3108_s7 + $0xd8] sm:$0xff] }
 0x1fd   : > { %1318 = vmatpush2.msra.mxu0 %v1078_v38  ;;  %1389 = vmatpush2.msra.mxu1 %v1080_v39  ;;  %v1524_v37 = vld [vmem:[%s3107_s6 + $0x60] sm:$0xff]  ;;  %v1555_v38 = vld [vmem:[%s3108_s7 + $0x58] sm:$0xff] }
 0x1fe   : > { %1319 = vmatprep.subr.mxu0 %v1071_v40  ;;  %1390 = vmatprep.subr.mxu1 %v1073_v41  ;;  %v1539_v39 = vld [vmem:[%s3107_s6 + $0xd8] sm:$0xff]  ;;  %v1570_v40 = vld [vmem:[%s3108_s7 + $0xd0] sm:$0xff] }
 0x1ff   : > { %1320 = vmatpush2.msra.mxu0 %v1070_v42  ;;  %1391 = vmatpush2.msra.mxu1 %v1072_v43  ;;  %v1523_v41 = vld [vmem:[%s3107_s6 + $0x58] sm:$0xff]  ;;  %v1554_v42 = vld [vmem:[%s3108_s7 + $0x50] sm:$0xff] }
 0x200   : > { %1321 = vmatprep.subr.mxu0 %v1063_v44  ;;  %1392 = vmatprep.subr.mxu1 %v1065_v45  ;;  %v1538_v43 = vld [vmem:[%s3107_s6 + $0xd0] sm:$0xff]  ;;  %v1569_v44 = vld [vmem:[%s3108_s7 + $0xc8] sm:$0xff] }
 0x201   : > { %1322 = vmatpush2.msra.mxu0 %v1062_v46  ;;  %1393 = vmatpush2.msra.mxu1 %v1064_v47  ;;  %v1522_v45 = vld [vmem:[%s3107_s6 + $0x50] sm:$0xff]  ;;  %v1553_v46 = vld [vmem:[%s3108_s7 + $0x48] sm:$0xff] }
 0x202   : > { %1323 = vmatprep.subr.mxu0 %v1055_v48  ;;  %1394 = vmatprep.subr.mxu1 %v1057_v49  ;;  %v1537_v47 = vld [vmem:[%s3107_s6 + $0xc8] sm:$0xff]  ;;  %v1568_v48 = vld [vmem:[%s3108_s7 + $0xc0] sm:$0xff] }
 0x203   : > { %1324 = vmatpush2.msra.mxu0 %v1054_v50  ;;  %1395 = vmatpush2.msra.mxu1 %v1056_v51  ;;  %v1521_v49 = vld [vmem:[%s3107_s6 + $0x48] sm:$0xff]  ;;  %v1552_v50 = vld [vmem:[%s3108_s7 + $0x40] sm:$0xff] }
 0x204   : > { %1325 = vmatprep.subr.mxu0 %v1047_v52  ;;  %1396 = vmatprep.subr.mxu1 %v1049_v53  ;;  %v1536_v51 = vld [vmem:[%s3107_s6 + $0xc0] sm:$0xff]  ;;  %v1567_v52 = vld [vmem:[%s3108_s7 + $0xb8] sm:$0xff] }
 0x205   : > { %1326 = vmatpush2.msra.mxu0 %v1046_v54  ;;  %1397 = vmatpush2.msra.mxu1 %v1048_v55  ;;  %v1520_v53 = vld [vmem:[%s3107_s6 + $0x40] sm:$0xff]  ;;  %v1551_v54 = vld [vmem:[%s3108_s7 + $0x38] sm:$0xff] }
 0x206   : > { %1327 = vmatprep.subr.mxu0 %v1039_v56  ;;  %1398 = vmatprep.subr.mxu1 %v1041_v57  ;;  %v1535_v55 = vld [vmem:[%s3107_s6 + $0xb8] sm:$0xff]  ;;  %v1566_v56 = vld [vmem:[%s3108_s7 + $0xb0] sm:$0xff] }
 0x207   : > { %1328 = vmatpush2.msra.mxu0 %v1038_v58  ;;  %1399 = vmatpush2.msra.mxu1 %v1040_v59  ;;  %v1519_v57 = vld [vmem:[%s3107_s6 + $0x38] sm:$0xff]  ;;  %v1550_v58 = vld [vmem:[%s3108_s7 + $0x30] sm:$0xff] }
 0x208   : > { %1329 = vmatprep.subr.mxu0 %v1031_v60  ;;  %1400 = vmatprep.subr.mxu1 %v1033_v61  ;;  %v1534_v59 = vld [vmem:[%s3107_s6 + $0xb0] sm:$0xff]  ;;  %v1565_v60 = vld [vmem:[%s3108_s7 + $0xa8] sm:$0xff] }
 0x209   : > { %1330 = vmatpush2.msra.mxu0 %v1030_v62  ;;  %1401 = vmatpush2.msra.mxu1 %v1032_v0  ;;  %v1518_v61 = vld [vmem:[%s3107_s6 + $0x30] sm:$0xff]  ;;  %v1549_v62 = vld [vmem:[%s3108_s7 + $0x28] sm:$0xff] }
 0x20a   : > { %1331 = vmatprep.subr.mxu0 %v1023_v3  ;;  %1402 = vmatprep.subr.mxu1 %v1025_v4  ;;  %v1533_v0 = vld [vmem:[%s3107_s6 + $0xa8] sm:$0xff]  ;;  %v1564_v3 = vld [vmem:[%s3108_s7 + $0xa0] sm:$0xff] }
 0x20b   : > { %1332 = vmatpush2.msra.mxu0 %v1022_v6  ;;  %1403 = vmatpush2.msra.mxu1 %v1024_v7  ;;  %v1517_v4 = vld [vmem:[%s3107_s6 + $0x28] sm:$0xff]  ;;  %v1548_v6 = vld [vmem:[%s3108_s7 + $0x20] sm:$0xff] }
 0x20c   : > { %1333 = vmatprep.subr.mxu0 %v1015_v8  ;;  %1404 = vmatprep.subr.mxu1 %v1017_v9  ;;  %v1532_v7 = vld [vmem:[%s3107_s6 + $0xa0] sm:$0xff]  ;;  %v1563_v8 = vld [vmem:[%s3108_s7 + $0x98] sm:$0xff] }
 0x20d   : > { %1334 = vmatpush2.msra.mxu0 %v1014_v10  ;;  %1405 = vmatpush2.msra.mxu1 %v1016_v13  ;;  %v1516_v9 = vld [vmem:[%s3107_s6 + $0x20] sm:$0xff]  ;;  %v1547_v10 = vld [vmem:[%s3108_s7 + $0x18] sm:$0xff] }
 0x20e   : > { %1335 = vmatprep.subr.mxu0 %v1007_v14  ;;  %1406 = vmatprep.subr.mxu1 %v1009_v15  ;;  %v1531_v13 = vld [vmem:[%s3107_s6 + $0x98] sm:$0xff]  ;;  %v1562_v14 = vld [vmem:[%s3108_s7 + $0x90] sm:$0xff] }
 0x20f   : > { %1336 = vmatpush2.msra.mxu0 %v1006_v16  ;;  %1407 = vmatpush2.msra.mxu1 %v1008_v17  ;;  %v1515_v15 = vld [vmem:[%s3107_s6 + $0x18] sm:$0xff]  ;;  %v1546_v16 = vld [vmem:[%s3108_s7 + $0x10] sm:$0xff] }
 0x210   : > { %1337 = vmatprep.subr.mxu0 %v999_v18  ;;  %1408 = vmatprep.subr.mxu1 %v1001_v21  ;;  %v1530_v17 = vld [vmem:[%s3107_s6 + $0x90] sm:$0xff]  ;;  %v1561_v18 = vld [vmem:[%s3108_s7 + $0x88] sm:$0xff] }
 0x211   : > { %1338 = vmatpush2.msra.mxu0 %v998_v22  ;;  %1339 = vmatprep.mubr.f32.mxu0 %v2655_v2  ;;  %v1514_v21 = vld [vmem:[%s3107_s6 + $0x10] sm:$0xff]  ;;  %v1545_v22 = vld [vmem:[%s3108_s7 + $0x8] sm:$0xff] }
 0x212   : > { %1409 = vmatpush2.msra.mxu1 %v1000_v23  ;;  %1410 = vmatprep.mubr.f32.mxu1 %v2655_v2  ;;  %v1574_v2 = vld [vmem:[%s3108_s7 + $0xf0] sm:$0xff]  ;;  %v1529_v23 = vld [vmem:[%s3107_s6 + $0x88] sm:$0xff] }
 0x213   : > { %1340 = vmatmul.mubr.f32.vlgmr.msra.gmra.mxu0 %v2658_v5  ;;  %1411 = vmatmul.mubr.f32.vlgmr.msra.gmra.mxu1 %v2658_v5  ;;  %v1543_v5 = vld [vmem:[%s3107_s6 + $0xf8] sm:$0xff] }
 0x214   : > { %2084 = vmatprep.subr.mxu0 %v1575_v24  ;;  %2119 = vmatprep.subr.mxu1 %v1543_v5  ;;  %v1560_v24 = vld [vmem:[%s3108_s7 + $0x80] sm:$0xff] }
 0x215   : > { %2085 = vmatpush3.msra.mxu0 %v1559_v25  ;;  %2120 = vmatpush3.msra.mxu1 %v1527_v27  ;;  %v1511_v25 = vld [vmem:[%s1510_s26] ss:$8 sm:$0x3]  ;;  %s862_s26 = scalar_lea.vmem [#allocation2], %s2674_s25  ;;  %s847_s25 = sadd.s32 %s3125_s28, %s2923_s1 }
 0x216   : > { %2086 = vmatprep.subr.mxu0 %v1574_v2  ;;  %2121 = vmatprep.subr.mxu1 %v1542_v29  ;;  %v1544_v2 = vld [vmem:[%s3108_s7] sm:$0xff]  ;;  %v1580_v5 = vrot.slane %v1511_v25, %v2623_v1  ;;  %v1513_v27 = vld [vmem:[%s3107_s6 + $0x8] sm:$0xff]  ;;  %p2933_p4 = scmp.lt.s32.totalorder %s2422_s5, %s847_s25  ;;  %s1961_s5 = sadd.s32 1, %s2422_s5  }
 0x217   : > { %2087 = vmatpush3.msra.mxu0 %v1558_v26  ;;  %2122 = vmatpush3.msra.mxu1 %v1526_v30  ;;  %v1584_v26 = vrot.slane %v1511_v25, %v2632_v20  ;;  %v1512_v29 = vld [vmem:[%s3107_s6] sm:$0xff]  ;;  %v2431_v30 = vmov 0.0   ;;  %p835_p13 = scmp.ge.s32.totalorder %s1961_s5, 40  }
 0x218   : > { %2088 = vmatprep.subr.mxu0 %v1573_v28  ;;  %2123 = vmatprep.subr.mxu1 %v1541_v31  ;;  %v1528_v28 = vld [vmem:[%s3107_s6 + $0x80] sm:$0xff]  ;;  %v1755_v31 = vld [vmem:[%s3110_s9 + $0x70] sm:$0xff]  ;;  %s850_s16 = scalar_select %p2933_p4, 1, 0 }
 0x219   : > { %2089 = vmatpush3.msra.mxu0 %v1557_v19  ;;  %2124 = vmatpush3.msra.mxu1 %v1525_v33  ;;  %v1756_v19 = vld [vmem:[%s3110_s9 + $0x78] sm:$0xff]  ;;  %v1753_v33 = vld [vmem:[%s3110_s9 + $0x60] sm:$0xff]  ;;  %s2435_s21 = smov (%p835_p13), [#allocation16]  }
 0x21a   : > { %2090 = vmatprep.subr.mxu0 %v1572_v32  ;;  %2125 = vmatprep.subr.mxu1 %v1540_v35  ;;  %v1754_v32 = vld [vmem:[%s3110_s9 + $0x68] sm:$0xff]  ;;  %v1751_v35 = vld [vmem:[%s3110_s9 + $0x50] sm:$0xff]  ;;  %s3127_s30 = smov (!%p840_p5, %s849_s30), %s850_s16  ;;  %v854_v25 = vld [vmem:[#allocation4] sm:$0x3]  ;;  %s1997_s24 = sshll.u32 (%p835_p13), %s2435_s21, 4  ;;  %s1998_s24 = int_to_ptr.vmem [resolvable:$true] %s1997_s24 }
 0x21b   : > { %2091 = vmatpush3.msra.mxu0 %v1556_v34  ;;  %2126 = vmatpush3.msra.mxu1 %v1524_v37  ;;  %v1752_v34 = vld [vmem:[%s3110_s9 + $0x58] sm:$0xff]  ;;  %v1749_v37 = vld [vmem:[%s3110_s9 + $0x40] sm:$0xff]  ;;  %p852_p6 = scmp.eq.s32.totalorder %s3127_s30, 1  ;;  %s2356_s30 = scalar_lea.vmem (%p835_p13), %s1998_s24, 1280 }
 0x21c   : > { %2092 = vmatprep.subr.mxu0 %v1571_v36  ;;  %2127 = vmatprep.subr.mxu1 %v1539_v39  ;;  %v1750_v36 = vld [vmem:[%s3110_s9 + $0x48] sm:$0xff]  ;;  %v1747_v39 = vld [vmem:[%s3110_s9 + $0x30] sm:$0xff]  ;;  %p2357_p0 = scmp.ne.s32.totalorder (%p835_p13), %s1998_s24, %s2356_s30  ;;  %p2361_p1 = scmp.lt.s32.totalorder (%p835_p13), %s1998_s24, %s1998_s24 }
 0x21d   : > { %2093 = vmatpush3.msra.mxu0 %v1555_v38  ;;  %2128 = vmatpush3.msra.mxu1 %v1523_v41  ;;  %v1748_v38 = vld [vmem:[%s3110_s9 + $0x38] sm:$0xff]  ;;  %s1943_s17 = scalar_select %p852_p6, 1, 0 }
 0x21e   : > { %2094 = vmatprep.subr.mxu0 %v1570_v40  ;;  %2129 = vmatprep.subr.mxu1 %v1538_v43  ;;  %v2432_v40 = vmov 1966171168   ;;  %p1954_p7 = pnand %p852_p6, %p840_p5  ;;  %p2362_p2 = scmp.lt.s32.totalorder (%p835_p13), %s2356_s30, %s2356_s30 }
 0x21f   : > { %2095 = vmatpush3.msra.mxu0 %v1554_v42  ;;  %2130 = vmatpush3.msra.mxu1 %v1522_v45  ;;  %v1430_v41 = vunpack.c.l.s4 %v2432_v40 }
 0x220   : > { %2096 = vmatprep.subr.mxu0 %v1569_v44  ;;  %2131 = vmatprep.subr.mxu1 %v1537_v47  ;;  %p1955_p8 = pneg %p1954_p7  ;;  %p2363_p3 = por (%p835_p13), %p2362_p2, %p2361_p1 }
 0x221   : > { %2097 = vmatpush3.msra.mxu0 %v1553_v46  ;;  %2132 = vmatpush3.msra.mxu1 %v1521_v49  ;;  %v1431_v44 = vunpack.c.0.s8 %v1430_v41  ;;  %v1746_v41 = vld [vmem:[%s3110_s9 + $0x28] sm:$0xff] }
 0x222   : > { %2098 = vmatprep.subr.mxu0 %v1568_v48  ;;  %2133 = vmatprep.subr.mxu1 %v1536_v51  ;;  %p1959_p10 = pnand %p1958_p9, %p1955_p8  ;;  %p2364_p4 = pnand (%p835_p13), %p2363_p3, %p2357_p0 }
 0x223   : > { %2099 = vmatpush3.msra.mxu0 %v1552_v50  ;;  %2134 = vmatpush3.msra.mxu1 %v1520_v53  ;;  %v1434_v48 = vsub.s32 %v1431_v44, %v2620_v63  ;;  %v1743_v44 = vld [vmem:[%s3110_s9 + $0x10] sm:$0xff] }
 0x224   : > { %2100 = vmatprep.subr.mxu0 %v1567_v52  ;;  %2135 = vmatprep.subr.mxu1 %v1535_v55  ;;  %s3129_s1 = smov (!%p1959_p10, %s2923_s1), 30 }
 0x225   : > { %2101 = vmatpush3.msra.mxu0 %v1551_v54  ;;  %2136 = vmatpush3.msra.mxu1 %v1519_v57 }
 0x226   : > { %2102 = vmatprep.subr.mxu0 %v1566_v56  ;;  %2137 = vmatprep.subr.mxu1 %v1534_v59 }
 0x227   : > { %2103 = vmatpush3.msra.mxu0 %v1550_v58  ;;  %2138 = vmatpush3.msra.mxu1 %v1518_v61  ;;  %v863_v61 = vld [vmem:[%s862_s26] ss:$8 sm:$0xf] }
 0x228   : > { %2104 = vmatprep.subr.mxu0 %v1565_v60  ;;  %2139 = vmatprep.subr.mxu1 %v1533_v0 }
 0x229   : > { %2105 = vmatpush3.msra.mxu0 %v1549_v62  ;;  %2140 = vmatpush3.msra.mxu1 %v1517_v4  ;;  %v864_v62 = vld [vmem:[%s862_s26] ss:$8 sm:$0xf0] }
 0x22a   : > { %2106 = vmatprep.subr.mxu0 %v1564_v3  ;;  %2141 = vmatprep.subr.mxu1 %v1532_v7 }
 0x22b   : > { %2107 = vmatpush3.msra.mxu0 %v1548_v6  ;;  %2142 = vmatpush3.msra.mxu1 %v1516_v9  ;;  %v865_v6 = vor.u32 %v864_v62, %v863_v61 }
 0x22c   : > { %2108 = vmatprep.subr.mxu0 %v1563_v8  ;;  %2143 = vmatprep.subr.mxu1 %v1531_v13 }
 0x22d   : > { %2109 = vmatpush3.msra.mxu0 %v1547_v10  ;;  %2144 = vmatpush3.msra.mxu1 %v1515_v15 }
 0x22e   : > { %2110 = vmatprep.subr.mxu0 %v1562_v14  ;;  %2145 = vmatprep.subr.mxu1 %v1530_v17 }
 0x22f   : > { %2111 = vmatpush3.msra.mxu0 %v1546_v16  ;;  %2146 = vmatpush3.msra.mxu1 %v1514_v21 }
 0x230   : > { %2112 = vmatprep.subr.mxu0 %v1561_v18  ;;  %2147 = vmatprep.subr.mxu1 %v1529_v23 }
 0x231   : > { %2113 = vmatpush3.msra.mxu0 %v1545_v22  ;;  %1651 = vmatprep.mubr.f32.mxu0 %v1584_v26 }
 0x232   : > { %2114 = vmatprep.subr.mxu0 %v1560_v24  ;;  %2148 = vmatpush3.msra.mxu1 %v1513_v27 }
 0x233   : > { %2115 = vmatpush3.msra.mxu0 %v1544_v2  ;;  %2149 = vmatprep.subr.mxu1 %v1528_v28 }
 0x234   : > { %1652 = vmatmul.mubr.f32.vlgmr.msra.gmra.mxu0 %v1580_v5  ;;  %2150 = vmatpush3.msra.mxu1 %v1512_v29  ;;  %v1944_v5 = vstv %s1943_s17 }
 0x235   : > { %2188 = vmatprep.subr.mxu0 %v2431_v30  ;;  %2223 = vmatprep.subr.mxu1 %v2431_v30  ;;  %vm2947_vm3 = vcmp.eq.s32.totalorder %v1944_v5, 1 }
 0x236   : > { %2189 = vmatpush3.msra.mxu0 %v1756_v19  ;;  %2220 = vmatprep.mubr.msk.f32.mxu0 %vm2433_vm4, %v2431_v30 }
 0x237   : > { %2190 = vmatprep.subr.mxu0 %v2431_v30 }
 0x238   : > { %2191 = vmatpush3.msra.mxu0 %v1755_v31 }
 0x239   : > { %2192 = vmatprep.subr.mxu0 %v2431_v30 }
 0x23a   : > { %2193 = vmatpush3.msra.mxu0 %v1754_v32 }
 0x23b   : > { %2194 = vmatprep.subr.mxu0 %v2431_v30 }
 0x23c   : > { %2195 = vmatpush3.msra.mxu0 %v1753_v33 }
 0x23d   : > { %2196 = vmatprep.subr.mxu0 %v2431_v30 }
 0x23e   : > { %2197 = vmatpush3.msra.mxu0 %v1752_v34 }
 0x23f   : > { %2198 = vmatprep.subr.mxu0 %v2431_v30 }
 0x240   : > { %2199 = vmatpush3.msra.mxu0 %v1751_v35 }
 0x241   : > { %2200 = vmatprep.subr.mxu0 %v2431_v30 }
 0x242   : > { %2201 = vmatpush3.msra.mxu0 %v1750_v36 }
 0x243   : > { %2202 = vmatprep.subr.mxu0 %v2431_v30 }
 0x244   : > { %2203 = vmatpush3.msra.mxu0 %v1749_v37 }
 0x245   : > { %2204 = vmatprep.subr.mxu0 %v2431_v30 }
 0x246   : > { %2205 = vmatpush3.msra.mxu0 %v1748_v38  ;;  %v2303_v38 = vld [vmem:[#allocation3] sm:$0x3] }
 0x247   : > { %2206 = vmatprep.subr.mxu0 %v2431_v30 }
 0x248   : > { %2207 = vmatpush3.msra.mxu0 %v1747_v39 }
 0x249   : > { %2208 = vmatprep.subr.mxu0 %v2431_v30 }
 0x24a   : > { %2209 = vmatpush3.msra.mxu0 %v1746_v41 }
 0x24b   : > { %2210 = vmatprep.subr.mxu0 %v2431_v30 }
 0x291   : > { %v1199_v42 = vpop.f32.mrf.mxu0  ;;  %v1270_v43 = vpop.f32.mrf.mxu1 }
 0x293   : > { %v1201_v45 = vpop.f32.mrf.mxu0  ;;  %v1272_v46 = vpop.f32.mrf.mxu1 }
 0x294   : > { %v1425_v47 = vcombine.low %v1199_v42, %v1201_v45  ;;  %v1426_v49 = vcombine.low %v1270_v43, %v1272_v46  ;;  %v1745_v42 = vld [vmem:[%s3110_s9 + $0x20] sm:$0xff]  ;;  %v1744_v43 = vld [vmem:[%s3110_s9 + $0x18] sm:$0xff]  ;;  %v1742_v45 = vld [vmem:[%s3110_s9 + $0x8] sm:$0xff] }
 0x295   : > { %2211 = vmatpush3.msra.mxu0 %v1745_v42  ;;  %v1741_v46 = vld [vmem:[%s3110_s9] sm:$0xff] }
 0x296   : > { %v1435_v52 = vrot.slane %v1425_v47, %v1434_v48  ;;  %v1442_v53 = vrot.slane %v1426_v49, %v1434_v48  ;;  %2212 = vmatprep.subr.mxu0 %v2431_v30  ;;  %v1844_v47 = vld [vmem:[%s3112_s11 + $0x78] sm:$0xff]  ;;  %v1842_v49 = vld [vmem:[%s3112_s11 + $0x68] sm:$0xff] }
 0x297   : > { %2213 = vmatpush3.msra.mxu0 %v1744_v43 }
 0x298   : > { %v1457_v58 = vcombine.low %v1435_v52, %v1442_v53  ;;  %2214 = vmatprep.subr.mxu0 %v2431_v30  ;;  %v1839_v52 = vld [vmem:[%s3112_s11 + $0x50] sm:$0xff]  ;;  %v1838_v53 = vld [vmem:[%s3112_s11 + $0x48] sm:$0xff] }
 0x299   : > { %2215 = vmatpush3.msra.mxu0 %v1743_v44 }
 0x29a   : > { %v1465_v3 = vrot.slane %v1457_v58, %v1434_v48  ;;  %2216 = vmatprep.subr.mxu0 %v2431_v30  ;;  %v1833_v58 = vld [vmem:[%s3112_s11 + $0x20] sm:$0xff] }
 0x29b   : > { %2217 = vmatpush3.msra.mxu0 %v1742_v45 }
 0x29c   : > { %2218 = vmatprep.subr.mxu0 %v2431_v30 }
 0x29d   : > { %2219 = vmatpush3.msra.mxu0 %v1741_v46 }
 0x2d3   : > { %v1341_v50 = vpop.f32.mrf.mxu0  ;;  %v1412_v51 = vpop.f32.mrf.mxu1 }
 0x2d5   : > { %v1343_v54 = vpop.f32.mrf.mxu0  ;;  %v1414_v55 = vpop.f32.mrf.mxu1 }
 0x2d6   : > { %v1427_v56 = vcombine.low %v1341_v50, %v1343_v54  ;;  %v1428_v57 = vcombine.low %v1412_v51, %v1414_v55  ;;  %v1841_v50 = vld [vmem:[%s3112_s11 + $0x60] sm:$0xff]  ;;  %v1840_v51 = vld [vmem:[%s3112_s11 + $0x58] sm:$0xff] }
 0x2d7   : > { %v1837_v54 = vld [vmem:[%s3112_s11 + $0x40] sm:$0xff]  ;;  %v1836_v55 = vld [vmem:[%s3112_s11 + $0x38] sm:$0xff] }
 0x2d8   : > { %v1449_v59 = vrot.slane %v1427_v56, %v1434_v48  ;;  %v1456_v60 = vrot.slane %v1428_v57, %v1434_v48  ;;  %v1835_v56 = vld [vmem:[%s3112_s11 + $0x30] sm:$0xff]  ;;  %v1834_v57 = vld [vmem:[%s3112_s11 + $0x28] sm:$0xff] }
 0x2da   : > { %v1458_v0 = vcombine.low %v1449_v59, %v1456_v60  ;;  %v1832_v59 = vld [vmem:[%s3112_s11 + $0x18] sm:$0xff] }
 0x2dc   : > { %v1472_v4 = vrot.slane %v1458_v0, %v1434_v48  ;;  %v1843_v48 = vld [vmem:[%s3112_s11 + $0x70] sm:$0xff] }
 0x2de   : > { %v1473_v7 = vcombine.low %v1465_v3, %v1472_v4 }
 0x2e0   : > { %v1475_v8 = vadd.f32 %v1473_v7, %v865_v6  ;;  %v1738_v6 = vld [vmem:[%s3109_s8] sm:$0x1] }
 0x2e2   : > { %v2062_v9 = vmul.f32 -1.442695, %v1475_v8  ;;  %v1483_v10 = vrot.slane %v1475_v8, 2  ;;  %v1494_v14 = vrot.slane %v1475_v8, 6  ;;  %v1491_v17 = vrot.slane %v1475_v8, 4 }
 0x2e4   : > { %2285 = vpow2.f32 %v2062_v9  ;;  %v2063_v13 = vmul.f32 -1.442695, %v1483_v10  ;;  %v2064_v15 = vmul.f32 -1.442695, %v1494_v14  ;;  %v1831_v10 = vld [vmem:[%s3112_s11 + $0x10] sm:$0xff]  ;;  %v1829_v14 = vld [vmem:[%s3112_s11] sm:$0xff] }
 0x2e6   : > { %2287 = vpow2.f32 %v2063_v13  ;;  %v1830_v13 = vld [vmem:[%s3112_s11 + $0x8] sm:$0xff] }
 0x2e7   : > { %2289 = vpow2.f32 %v2064_v15  ;;  %v1757_v15 = vld [vmem:[%s3111_s10] sm:$0x1] }
 0x2f1   : > { %v2286_v16 = vpop.eup %2285 }
 0x2f2   : > { %v1479_v18 = vadd.f32 1.0, %v2286_v16 }
 0x2f3   : > { %v2288_v21 = vpop.eup %2287 }
 0x2f4   : > { %2291 = vrcp.f32 %v1479_v18  ;;  %v1488_v22 = vadd.f32 1.0, %v2288_v21  ;;  %v2290_v23 = vpop.eup %2289  ;;  %v2116_v60 = vpop.f32.mrf.mxu0 }
 0x2f5   : > { %2293 = vtanh.f32 %v1491_v17  ;;  %v1499_v27 = vadd.f32 1.0, %v2290_v23 }
 0x2f6   : > { %2295 = vrcp.f32 %v1488_v22  ;;  %v2117_v61 = vpop.f32.mrf.mxu0  ;;  %v1845_v22 = vld [vmem:[%s3113_s12] sm:$0x1] }
 0x2f7   : > { %2297 = vrcp.f32 %v1499_v27  ;;  %v2118_v3 = vadd.f32 %v2117_v61, %v2116_v60 }
 0x301   : > { %v2292_v24 = vpop.eup %2291 }
 0x302   : > { %v2294_v2 = vpop.eup %2293 }
 0x303   : > { %v2296_v26 = vpop.eup %2295  ;;  %v1503_v29 = vmul.f32 %v2294_v2, %v2292_v24 }
 0x304   : > { %v1502_v28 = vmul.f32 %v2296_v26, %v854_v25  ;;  %v2298_v33 = vpop.eup %2297 }
 0x306   : > { %v1504_v31 = vadd.f32 %v1503_v29, %v1502_v28 }
 0x308   : > { %2299 = vtanh.f32 %v1504_v31  ;;  %v1948_v32 = vsel %vm2947_vm3, %v1504_v31, %v854_v25 }
 0x309   : > { %1949 = vst.msk [vmem:[#allocation4] sm:$0x3] %vm2592_vm0, %v1948_v32 }
 0x315   : > { %v2300_v34 = vpop.eup %2299 }
 0x316   : > { %v1506_v35 = vmul.f32 %v2300_v34, %v2298_v33  ;;  %v1934_v34 = vstv %s1933_s20 }
 0x318   : > { %v1665_v36 = vrot.slane %v1506_v35, %v2632_v20  ;;  %v1661_v37 = vrot.slane %v1506_v35, %v2623_v1  ;;  %v1946_v39 = vsel %vm2947_vm3, %v1506_v35, %v2303_v38  ;;  %v1950_v40 = vsel %vm2947_vm3, %v1506_v35, 0.0 }
 0x319   : > { %1947 = vst.msk [vmem:[#allocation3] sm:$0x3] %vm2592_vm0, %v1946_v39  ;;  %1952 = vst.msk [vmem:[%s1951_s18] ss:$8 sm:$0x3] %vm2592_vm0, %v1950_v40  ;;  %v2434_v38 = vmov 0  }
 0x31a   : > { %1732 = vmatprep.mubr.f32.mxu1 %v1665_v36 }
 0x31b   : > { %1733 = vmatmul.mubr.f32.vlgmr.msra.gmra.mxu1 %v1661_v37 }
 0x31c   : > { %2255 = vmatprep.mubr.msk.f32.mxu1 %vm2433_vm4, %v2431_v30  ;;  %2224 = vmatpush3.msra.mxu1 %v1844_v47 }
 0x31d   : > { %2225 = vmatprep.subr.mxu1 %v2431_v30 }
 0x31e   : > { %2226 = vmatpush3.msra.mxu1 %v1843_v48 }
 0x31f   : > { %2227 = vmatprep.subr.mxu1 %v2431_v30 }
 0x320   : > { %2228 = vmatpush3.msra.mxu1 %v1842_v49 }
 0x321   : > { %2229 = vmatprep.subr.mxu1 %v2431_v30 }
 0x322   : > { %2230 = vmatpush3.msra.mxu1 %v1841_v50 }
 0x323   : > { %2231 = vmatprep.subr.mxu1 %v2431_v30 }
 0x324   : > { %2232 = vmatpush3.msra.mxu1 %v1840_v51 }
 0x325   : > { %2233 = vmatprep.subr.mxu1 %v2431_v30 }
 0x326   : > { %2234 = vmatpush3.msra.mxu1 %v1839_v52 }
 0x327   : > { %2235 = vmatprep.subr.mxu1 %v2431_v30 }
 0x328   : > { %2236 = vmatpush3.msra.mxu1 %v1838_v53 }
 0x329   : > { %2237 = vmatprep.subr.mxu1 %v2431_v30 }
 0x32a   : > { %2238 = vmatpush3.msra.mxu1 %v1837_v54 }
 0x32b   : > { %2239 = vmatprep.subr.mxu1 %v2431_v30 }
 0x32c   : > { %2240 = vmatpush3.msra.mxu1 %v1836_v55 }
 0x32d   : > { %2241 = vmatprep.subr.mxu1 %v2431_v30 }
 0x32e   : > { %2242 = vmatpush3.msra.mxu1 %v1835_v56 }
 0x32f   : > { %2243 = vmatprep.subr.mxu1 %v2431_v30 }
 0x330   : > { %2244 = vmatpush3.msra.mxu1 %v1834_v57 }
 0x331   : > { %2245 = vmatprep.subr.mxu1 %v2431_v30 }
 0x332   : > { %2246 = vmatpush3.msra.mxu1 %v1833_v58 }
 0x333   : > { %2247 = vmatprep.subr.mxu1 %v2431_v30 }
 0x334   : > { %2248 = vmatpush3.msra.mxu1 %v1832_v59 }
 0x335   : > { %2249 = vmatprep.subr.mxu1 %v2431_v30 }
 0x336   : > { %2250 = vmatpush3.msra.mxu1 %v1831_v10 }
 0x337   : > { %2251 = vmatprep.subr.mxu1 %v2431_v30 }
 0x338   : > { %2252 = vmatpush3.msra.mxu1 %v1830_v13 }
 0x339   : > { %2253 = vmatprep.subr.mxu1 %v2431_v30 }
 0x33a   : > { %2254 = vmatpush3.msra.mxu1 %v1829_v14 }
 0x3db   : > { %v2151_v62 = vpop.f32.mrf.mxu1 }
 0x3dd   : > { %v2152_v0 = vpop.f32.mrf.mxu1 }
 0x3de   : > { %v2153_v4 = vadd.f32 %v2152_v0, %v2151_v62 }
 0x3e0   : > { %v1735_v7 = vadd.f32 %v2153_v4, %v2118_v3 }
 0x3e2   : > { %v1739_v8 = vadd.f32 %v1738_v6, %v1735_v7 }
 0x3e4   : > { %v1740_v9 = vmax.f32 %v1739_v8, 0.0 }
 0x3e6   : > { %2221 = vmatmul.mubr.f32.vlgmr.msra.gmra.mxu0 %v1740_v9 }
 0x4a6   : > { %v1824_v16 = vpop.f32.mrf.mxu0 }
 0x4a7   : > { %v1825_v17 = vadd.f32 %v1824_v16, %v1757_v15 }
 0x4a8   : > { %v2222_v18 = vpop.f32.mrf.mxu0 }
 0x4a9   : > { %v1828_v21 = vmax.f32 %v1825_v17, 0.0 }
 0x4ab   : > { %2256 = vmatmul.mubr.f32.vlgmr.msra.gmra.mxu1 %v1828_v21 }
 0x56b   : > { %v1912_v23 = vpop.f32.mrf.mxu1 }
 0x56c   : > { %v1913_v24 = vadd.f32 %v1912_v23, %v1845_v22 }
 0x56d   : > { %v2257_v25 = vpop.f32.mrf.mxu1 }
 0x56e   : > { %v1916_v2 = vmax.f32 %v1913_v24, 0.0 }
 0x570   : > { %v1917_v30 = vsel %vm831_vm1, %v1916_v2, -inf }
 0x571   : > { %v1919_v5 = vsel %vm1918_vm5, %v1917_v30, -inf }
 0x572   : > { %1920 = vmax.xlane.f32.xlu0 %v1919_v5 }
 0x5fb   : > { %v1921_v26 = vpop.xlane.xlu0 %1920 }
 0x5fc   : > { %v1922_v27 = vsub.f32 %v1916_v2, %v1921_v26 }
 0x5fe   : > { %v1923_v28 = vmul.f32 1.442695, %v1922_v27 }
 0x600   : > { %2301 = vpow2.f32 %v1923_v28 }
 0x60d   : > { %v2302_v29 = vpop.eup %2301 }
 0x60e   : > { %v1925_v19 = vsel %vm831_vm1, %v2302_v29, 0.0 }
 0x60f   : > { %v1930_v31 = vsel %vm1918_vm5, %v1925_v19, 0.0  ;;  %v1926_v32 = vsel %vm832_vm2, %v1925_v19, 0.0 }
 0x610   : > { %1931 = vadd.xlane.f32.xlu0 %v1930_v31  ;;  %v1927_v33 = vsel %vm1918_vm5, %v1926_v32, 0.0 }
 0x611   : > { %1928 = vadd.xlane.f32.xlu1 %v1927_v33 }
 0x699   : > { %v1932_v35 = vpop.xlane.xlu0 %1931 }
 0x69a   : > { %v1935_v36 = vmul.f32 %v1934_v34, %v1932_v35  ;;  %v1929_v37 = vpop.xlane.xlu1 %1928 }
 0x69c   : > { %vm1936_vm7 = vcmp.gt.f32.partialorder %v1935_v36, %v1929_v37 }
 0x69d   : > { %v1937_v39 = vsel %vm1936_vm7, 1, %v2434_v38 }
 0x69e   : > { %1939 = vst.msk [vmem:[#allocation5] sm:$0x1] %vm1938_vm6, %v1937_v39 }
 0x6a5   : > { %v1940_v40 = vld [vmem:[#allocation5] sm:$0x1] }
 0x6a6   : > { %2258 = vpush %v1940_v40 }
 0x6d7   : > { %s2259_s22 = spop %2258 }
 0x6d8   : > { %p1942_p11 = scmp.gt.s32.totalorder %s2259_s22, 0 }
 0x6d9   :  { %837 = sbr.rel (!%p835_p13) target bundleno = 399 (0x18f), region = 116 }
 0x6da   : > { %p1956_p12 = pnand %p1955_p8, %p1942_p11 }
 0x6dc   : > { %s3131_s1 = smov (!%p1956_p12, %s3129_s1), %s1961_s5 }
 0x6dd   : > { %1964 = sst [smem:[#allocation6]] %s3131_s1 }
 0x6de   :  { %s3079_s4 = sld [smem:[#allocation6]] }
 0x6df   :  { %2367 = shalt.err (!%p2364_p4)
}
 0x6e0   :  { %s2436_s26 = smov 256   ;;  %s2437_s1 = smov 16  }
 0x6e1   :  { %2003 = dma.vmem_to_hbm [thread:$0]  %s1998_s24, 1280, %s3114_s13, [#allocation10], %s2436_s26, %s2436_s26, %s2437_s1  }
 0x6e2   :  { %s2438_s2 = smov [#allocation17]   ;;  %s2439_s7 = smov 40  }
 0x6e3   :  { %s2010_s6 = sshll.u32 %s2438_s2, 4  ;;  %1991 = sst [smem:[#allocation19 + $0x3]] %s2439_s7  ;;  %s2011_s6 = int_to_ptr.vmem [resolvable:$true] %s2010_s6 }
 0x6e4   :  { %s2074_s8 = sadd.s32 4294967295, %s3079_s4  ;;  %s1966_s28 = ssub.s32 %s3101_s0, %s3079_s4 }
 0x6e5   :  { %s1972_s9 = sshra.s32 %s2074_s8, 3  ;;  %s1975_s10 = sand.u32 7, %s2074_s8 }
 0x6e6   :  { %s2083_s11 = sshll.u32 %s1972_s9, 4  ;;  %p1967_p5 = scmp.lt.s32.totalorder %s1966_s28, 10 }
 0x6e7   :  { %s1978_s25 = sadd.s32 %s2083_s11, %s1975_s10  ;;  %p2069_p6 = scmp.gt.s32.totalorder %s1966_s28, 0 }
 0x6e8   :  { %s1979_s29 = scalar_lea.vmem [#allocation16], %s1978_s25  ;;  %1983 = sst [smem:[#allocation19]] %s3079_s4 }
 0x6e9   :  { %v1980_v12 = vld [vmem:[%s1979_s29] ss:$8 sm:$0x3]  ;;  %s1968_s13 = scalar_select %p1967_p5, %s1966_s28, 10 }
 0x6ea   :  { %1981 = vst.msk [vmem:[#allocation17] sm:$0x3] %vm2592_vm0, %v1980_v12  ;;  %s1987_s16 = sadd.s32 9, %s3079_s4  ;;  %s2376_s17 = scalar_lea.vmem %s2011_s6, 32 }
 0x6eb   :  { %p2377_p7 = scmp.ne.s32.totalorder %s2011_s6, %s2376_s17  ;;  %p2381_p8 = scmp.lt.s32.totalorder %s2011_s6, %s2011_s6 }
 0x6ec   :  { %p2382_p9 = scmp.lt.s32.totalorder %s2376_s17, %s2376_s17 }
 0x6ee   :  { %p2383_p10 = por %p2382_p9, %p2381_p8 }
 0x6f0   :  { %p2384_p11 = pnand %p2383_p10, %p2377_p7 }
 0x6f2   :  { %2387 = shalt.err (!%p2384_p11)
}
 0x6f3   :  { %2013 = dma.vmem_to_hbm [thread:$0]  %s2011_s6, 32, %s3115_s14, [#allocation18]  }
 0x6f4   :  { %s3133_s13 = smov (!%p2069_p6, %s1968_s13), 0  ;;  %1989 = sst [smem:[#allocation19 + $0x2]] %s1987_s16 }
 0x6f5   :  { %s1984_s3 = sadd.s32 %s3133_s13, %s3079_s4  ;;  %s2440_s19 = smov [#allocation19]  }
 0x6f6   :  { %1986 = sst [smem:[#allocation19 + $0x1]] %s1984_s3 }
 0x6f7   :  { %2021 = dma.smem_to_hbm %s2440_s19, 16, %s3116_s15, [#allocation11]  }
 0x6f8   :  { %2414 = dma.done.wait [#allocation10], 1280  }
 0x6f9   :  { %2415 = vsyncadd [#allocation10], 4294966016 }
 0x6fa   :  { %2416 = dma.done.wait [#allocation18], 32  }
 0x6fb   :  { %2417 = vsyncadd [#allocation18], 4294967264 }
 0x6fc   :  { %2418 = dma.done.wait [#allocation11], 16  }
 0x6fd   :  { %2419 = vsyncadd [#allocation11], 4294967280 }
 0x6fe   :  { %2031 = sfence }
 0x6ff   :  { %2032 = vsyncpa [#allocation9], 1 }
 0x700   :  { %2033 = vsyncpa [#allocation15], 1 }
 0x701   :  { %2034 = vsyncpa [#allocation10], 1 }
 0x702   :  { %2035 = vsyncpa [#allocation18], 1 }
 0x703   :  { %2036 = vsyncpa [#allocation11], 1 }
 0x704   :  { %2037 = vsyncpa [#allocation12], 1 }

</bundles_post_ra>
